<compile_context>
chip_gen: v7x
topology: tpu7x:2x2x1
jax: 0.10.0
libtpu: 0.0.40
codegen_flags: <defaults>
</compile_context>

<pallas_src>
import math

import jax
import jax.numpy as jnp
from jax.experimental import pallas as pl
from jax.experimental.pallas import tpu as pltpu

LANE = 128


# ----------------------------- glue: timestep embedding (host / reference) -----------------------------
def timestep_embedding(timesteps, dim, max_period=10000):
    half = dim // 2
    freqs = jnp.exp(
        -math.log(max_period) * jnp.arange(0, half, dtype=jnp.float32) / half
    )
    args = timesteps[:, None].astype(jnp.float32) * freqs[None]
    embedding = jnp.concatenate([jnp.cos(args), jnp.sin(args)], axis=-1)
    if dim % 2:
        embedding = jnp.concatenate(
            [embedding, jnp.zeros_like(embedding[:, :1])], axis=-1
        )
    return embedding


# ----------------------------- small helpers -----------------------------
def _silu(v):
    return v * jax.nn.sigmoid(v)


def _round_up(n, m):
    return ((n + m - 1) // m) * m


def _pad2(a, rows, cols):
    r, c = a.shape
    return jnp.pad(a, ((0, rows - r), (0, cols - c)))


def _vmem_defaults():
    """Per-generation (vmem_budget, vmem_limit_cap) in bytes."""
    try:
        cap = int(pltpu.get_tpu_info().vmem_capacity_bytes)
    except Exception:
        cap = 64 * 2**20  # conservative: assume v7x-sized (64 MiB per TC)
    if cap >= 100 * 2**20:          # v5e / v6e: 128 MiB physical
        return 80 * 2**20, 100 * 2**20
    return 36 * 2**20, 44 * 2**20   # v7x: 64 MiB physical per TC


# ----------------------------- Pallas kernels -----------------------------
def _make_kernel(num_net, compute_dtype, fused, half):
    """Fused FeedForward body for one (TB, ·) batch tile; weights stay VMEM-resident."""

    def run_net(h, net_refs, out_ref):
        # net: [SiLU, Linear] * num_net (SiLU in f32, matmul operands in compute_dtype).
        for i in range(num_net):
            w = net_refs[2 * i]
            b = net_refs[2 * i + 1]
            h = _silu(h)
            h = jnp.dot(h.astype(compute_dtype), w[...],
                        preferred_element_type=jnp.float32) + b[...]
        out_ref[...] = h.astype(out_ref.dtype)

    if fused:
        # Optimized: timestep embedding computed in-kernel from a (TB,1) time column.
        def kernel(time_ref, x_ref, freqs_ref, wt1, bt1, wt2, win, bxt, *rest):
            net_refs, out_ref = rest[:-1], rest[-1]
            # t_emb = [cos(t*freqs), sin(t*freqs), 0-pad] built lane-wise (EUP is idle here).
            args = time_ref[...] * freqs_ref[...]                      # (TB,1)*(1,Tp) -> (TB,Tp) f32
            lane = jax.lax.broadcasted_iota(jnp.int32, args.shape, 1)
            emb = jnp.where(lane < half, jnp.cos(args),
                            jnp.where(lane < 2 * half, jnp.sin(args), 0.0))
            t1 = jnp.dot(emb.astype(compute_dtype), wt1[...],
                         preferred_element_type=jnp.float32) + bt1[...]
            t1 = _silu(t1)
            # input_enc(x) + second t_module linear; bxt = bin + bt2 (exact fold).
            h = jnp.dot(t1.astype(compute_dtype), wt2[...],
                        preferred_element_type=jnp.float32)
            h = h + jnp.dot(x_ref[...].astype(compute_dtype), win[...],
                            preferred_element_type=jnp.float32)
            h = h + bxt[...]
            run_net(h, net_refs, out_ref)
        return kernel

    # Fallback (previously validated structure): host-side t_emb, padded x, stacked matmul.
    def kernel(temb_ref, x_ref, wt1, bt1, w_xt, bxt, *rest):
        net_refs, out_ref = rest[:-1], rest[-1]
        t1 = jnp.dot(temb_ref[...], wt1[...], preferred_element_type=jnp.float32) + bt1[...]
        t1 = _silu(t1)
        xt = jnp.concatenate([x_ref[...], t1.astype(compute_dtype)], axis=-1)
        h = jnp.dot(xt, w_xt[...], preferred_element_type=jnp.float32) + bxt[...]
        run_net(h, net_refs, out_ref)
    return kernel


# ----------------------------- one-time parameter preparation -----------------------------
def prepare_params(params, *, time_embed_dim=128, compute_dtype=jnp.bfloat16,
                   max_period=10000):
    """Pad + cast weights ONCE (hoisted out of the hot path)."""
    cd = jnp.dtype(compute_dtype)
    in_dim = params["win"].shape[0]
    hidden_dim = params["wt1"].shape[1]
    net = params["net"]
    out_dim = net[-1][0].shape[1]
    half = time_embed_dim // 2

    Tp = _round_up(time_embed_dim, LANE)
    Hp = _round_up(hidden_dim, LANE)
    Op = _round_up(out_dim, LANE)
    Ip = _round_up(in_dim, LANE)

    freqs = jnp.exp(-math.log(max_period) * jnp.arange(half, dtype=jnp.float32) / half)
    freqs2 = jnp.zeros((1, Tp), jnp.float32)
    freqs2 = freqs2.at[0, :half].set(freqs).at[0, half:2 * half].set(freqs)

    net_padded = []
    for w, b in net:
        wi = _round_up(w.shape[0], LANE)
        wo = _round_up(w.shape[1], LANE)
        net_padded.append((_pad2(w, wi, wo).astype(cd),
                           _pad2(b, 1, wo).astype(jnp.float32)))

    return {
        "compute_dtype": cd, "time_embed_dim": time_embed_dim, "half": half,
        "in_dim": in_dim, "hidden_dim": hidden_dim, "out_dim": out_dim,
        "Tp": Tp, "Hp": Hp, "Op": Op, "Ip": Ip,
        "freqs2": freqs2,
        "wt1": _pad2(params["wt1"], Tp, Hp).astype(cd),
        "bt1": _pad2(params["bt1"], 1, Hp).astype(jnp.float32),
        "wt2": _pad2(params["wt2"], Hp, Hp).astype(cd),
        "win": _pad2(params["win"], in_dim, Hp).astype(cd),          # rows left at in_dim
        "bxt": (_pad2(params["bin"], 1, Hp)
                + _pad2(params["bt2"], 1, Hp)).astype(jnp.float32),  # exact bias fold
        "net": net_padded,
    }


# ----------------------------- wrapper -----------------------------
def _run(inputs, time, p, *, fused, buffered, max_batch_tile, vmem_budget_bytes,
         out_dtype, trim_output):
    cd = p["compute_dtype"]
    cdsz = cd.itemsize
    out_dt = jnp.dtype(out_dtype)
    B, in_dim = inputs.shape
    assert in_dim == p["in_dim"]
    Tp, Hp, Op, Ip = p["Tp"], p["Hp"], p["Op"], p["Ip"]
    num_net = len(p["net"])
    sub = 8 * 4 // cdsz                     # sublane multiple: 8 for f32, 16 for bf16

    budget, limit_cap = _vmem_defaults()
    if vmem_budget_bytes is not None:
        budget = vmem_budget_bytes
    if max_batch_tile is None:
        max_batch_tile = 2048 if limit_cap > 64 * 2**20 else 1024

    # ---- resident weights ----
    if fused:
        weight_args = [p["freqs2"], p["wt1"], p["bt1"], p["wt2"], p["win"], p["bxt"]]
    else:
        w_xt = jnp.concatenate(
            [jnp.pad(p["win"], ((0, Ip - in_dim), (0, 0))), p["wt2"]], axis=0)
        weight_args = [p["wt1"], p["bt1"], w_xt, p["bxt"]]
    for w, b in p["net"]:
        weight_args += [w, b]
    weight_bytes = sum(int(a.size) * a.dtype.itemsize for a in weight_args)
    weight_buf = weight_bytes * (1 if buffered else 2)

    # ---- per-row bytes (pipelined I/O is double-buffered; f32 intermediates as slack) ----
    in_row = (4 + in_dim * 4) if fused else (Tp + Ip) * cdsz
    out_row = Op * out_dt.itemsize
    widths = [Tp, Hp, Ip + Hp] + [w.shape[1] for w, _ in p["net"]]
    scratch_row = 4 * max(widths) * 4
    row_bytes = 2 * (in_row + out_row) + scratch_row

    # ---- choose batch tile ----
    B8 = _round_up(B, sub)
    TB = max(sub, (min(max_batch_tile, B8) // sub) * sub)
    if B8 >= 2 * sub:                        # guarantee >= 2 grid steps (v7x dual-TC sharding)
        TB = min(TB, _round_up((B8 + 1) // 2, sub))
    while TB > sub and weight_buf + TB * row_bytes > budget:
        TB -= sub
    # TODO(synk): add a layer-streaming path (grid over net layers + pl.when accumulator)
    # for configs whose resident weights alone approach the v7x budget.
    B_pad = _round_up(B8, TB)
    grid = (B_pad // TB,)

    # ---- activations ----
    if fused:
        time_col = _pad2(time.astype(jnp.float32).reshape(B, 1), B_pad, 1)
        x_arr = _pad2(inputs.astype(jnp.float32), B_pad, in_dim)     # un-padded lanes, full-dim block
        act_args = [time_col, x_arr]
        act_specs = [pl.BlockSpec((TB, 1), lambda i: (i, 0)),
                     pl.BlockSpec((TB, in_dim), lambda i: (i, 0))]
    else:
        t_emb = _pad2(timestep_embedding(time, p["time_embed_dim"]), B_pad, Tp).astype(cd)
        x_arr = _pad2(inputs, B_pad, Ip).astype(cd)
        act_args = [t_emb, x_arr]
        act_specs = [pl.BlockSpec((TB, Tp), lambda i: (i, 0)),
                     pl.BlockSpec((TB, Ip), lambda i: (i, 0))]

    def const_spec(shape):
        # VMEM-resident across grid steps; single buffer (no pointless double-buffering).
        if buffered:
            return pl.BlockSpec(shape, lambda i: (0, 0), pipeline_mode=pl.Buffered(1))
        return pl.BlockSpec(shape, lambda i: (0, 0))

    in_specs = act_specs + [const_spec(a.shape) for a in weight_args]
    out_specs = pl.BlockSpec((TB, Op), lambda i: (i, 0))

    # ---- advisory cost estimate ----
    per_row_macs = (Tp * Hp + Hp * Hp + in_dim * Hp) if fused else (Tp * Hp + (Ip + Hp) * Hp)
    per_row_macs += sum(w.shape[0] * w.shape[1] for w, _ in p["net"])
    trans_per_row = Hp * (1 + num_net) + (Tp if fused else 0)
    bytes_accessed = (sum(int(a.size) * a.dtype.itemsize for a in act_args)
                      + weight_bytes + B_pad * Op * out_dt.itemsize)

    vmem_need = weight_buf + TB * row_bytes
    vmem_limit = int(min(max(vmem_need + (8 << 20), 16 << 20), limit_cap))

    kernel = _make_kernel(num_net, cd, fused, p["half"])

    out = pl.pallas_call(
        kernel,
        grid=grid,
        in_specs=in_specs,
        out_specs=out_specs,
        out_shape=jax.ShapeDtypeStruct((B_pad, Op), out_dt),
        compiler_params=pltpu.CompilerParams(
            dimension_semantics=("parallel",), vmem_limit_bytes=vmem_limit),
        cost_estimate=pl.CostEstimate(
            flops=int(2 * B_pad * per_row_macs),
            transcendentals=int(B_pad * trans_per_row),
            bytes_accessed=int(bytes_accessed)),
    )(*act_args, *weight_args)

    if trim_output:
        return out[:B, :p["out_dim"]]
    return out


def feedforward_pallas(inputs, time, prepared, *, max_batch_tile=None,
                       vmem_budget_bytes=None, out_dtype=jnp.float32, trim_output=True):
    """Pallas-fused forward pass of FeedForward.

    inputs: (B, in_dim) f32; time: (B,) f32; prepared: output of prepare_params().
    Tries the fully-optimized configuration first (in-kernel t_emb, Buffered(1) weights)
    and falls back to the previously-validated structure if lowering rejects a feature.
    """
    attempts = ((True, True), (True, False), (False, False))
    last_err = None
    for fused, buffered in attempts:
        try:
            return _run(inputs, time, prepared, fused=fused, buffered=buffered,
                        max_batch_tile=max_batch_tile, vmem_budget_bytes=vmem_budget_bytes,
                        out_dtype=out_dtype, trim_output=trim_output)
        except Exception as e:   # lowering/compile fallback (wrapper is called eagerly)
            last_err = e
    raise last_err


# ----------------------------- pure-JAX reference -----------------------------
def feedforward_ref(inputs, time, params, *, time_embed_dim=128):
    t_emb = timestep_embedding(time, time_embed_dim)
    t = _silu(t_emb @ params["wt1"] + params["bt1"])
    t = t @ params["wt2"] + params["bt2"]
    x = inputs @ params["win"] + params["bin"]
    h = x + t
    for w, b in params["net"]:
        h = _silu(h) @ w + b
    return h


# ----------------------------- parameter init -----------------------------
def init_params(key, in_dim, hidden_dim, num_layers, out_dim, time_embed_dim=128):
    hidden_dims = [hidden_dim] * num_layers + [out_dim]

    def linear(k, fan_in, fan_out):
        kw, kb = jax.random.split(k)
        bound = 1.0 / math.sqrt(fan_in)
        w = jax.random.uniform(kw, (fan_in, fan_out), jnp.float32, -bound, bound)
        b = jax.random.uniform(kb, (1, fan_out), jnp.float32, -bound, bound)
        return w, b

    keys = jax.random.split(key, 3 + (len(hidden_dims) - 1))
    wt1, bt1 = linear(keys[0], time_embed_dim, hidden_dim)
    wt2, bt2 = linear(keys[1], hidden_dim, hidden_dim)
    win, bin_ = linear(keys[2], in_dim, hidden_dims[0])
    net = []
    for i in range(len(hidden_dims) - 1):
        w, b = linear(keys[3 + i], hidden_dims[i], hidden_dims[i + 1])
        net.append((w, b))
    return {"wt1": wt1, "bt1": bt1, "wt2": wt2, "bt2": bt2,
            "win": win, "bin": bin_, "net": net}


# ----------------------------- main -----------------------------
if __name__ == "__main__":
    in_dim, hidden_dim, num_layers, out_dim = 4, 32, 2, 4
    time_embed_dim = 128
    batch = 8

    key = jax.random.PRNGKey(0)
    kp, kx, kt = jax.random.split(key, 3)
    params = init_params(kp, in_dim, hidden_dim, num_layers, out_dim, time_embed_dim)

    inputs = jax.random.normal(kx, (batch, in_dim), jnp.float32)
    time = jax.random.uniform(kt, (batch,), jnp.float32, 0.0, 1.0)

    ref = feedforward_ref(inputs, time, params, time_embed_dim=time_embed_dim)

    # Exact-semantics path (f32 matmul operands); slight tolerance for in-kernel sin/cos.
    prep_f32 = prepare_params(params, time_embed_dim=time_embed_dim,
                              compute_dtype=jnp.float32)
    out_f32 = jax.block_until_ready(feedforward_pallas(inputs, time, prep_f32))
    assert out_f32.shape == (batch, out_dim)
    assert jnp.allclose(out_f32, ref, atol=1e-4, rtol=1e-4), (
        f"f32 max abs err {jnp.max(jnp.abs(out_f32 - ref))}"
    )

    # Optimized path (bf16 matmul operands, f32 accumulation) — looser tolerance.
    prep_bf16 = prepare_params(params, time_embed_dim=time_embed_dim,
                               compute_dtype=jnp.bfloat16)
    out_bf16 = jax.block_until_ready(feedforward_pallas(inputs, time, prep_bf16))
    assert out_bf16.shape == (batch, out_dim)
    assert jnp.allclose(out_bf16, ref, atol=5e-2, rtol=5e-2), (
        f"bf16 max abs err {jnp.max(jnp.abs(out_bf16 - ref))}"
    )

    print("KERNEL_OK")
</pallas_src>

<mosaic_0001>
module attributes {stable_mosaic.version = 11 : i64} {
  func.func @kernel(%arg0: i32, %arg1: memref<8x1xf32, #tpu.memory_space<vmem>>, %arg2: memref<8x4xf32, #tpu.memory_space<vmem>>, %arg3: memref<1x128xf32, #tpu.memory_space<vmem>>, %arg4: memref<128x128xf32, #tpu.memory_space<vmem>>, %arg5: memref<1x128xf32, #tpu.memory_space<vmem>>, %arg6: memref<128x128xf32, #tpu.memory_space<vmem>>, %arg7: memref<4x128xf32, #tpu.memory_space<vmem>>, %arg8: memref<1x128xf32, #tpu.memory_space<vmem>>, %arg9: memref<128x128xf32, #tpu.memory_space<vmem>>, %arg10: memref<1x128xf32, #tpu.memory_space<vmem>>, %arg11: memref<128x128xf32, #tpu.memory_space<vmem>>, %arg12: memref<1x128xf32, #tpu.memory_space<vmem>>, %arg13: memref<8x128xf32, #tpu.memory_space<vmem>>) attributes {dimension_semantics = [#tpu.dimension_semantics<parallel>], iteration_bounds = array<i64: 1>, scalar_prefetch = 0 : i64, scratch_operands = 0 : i64, tpu.core_type = #tpu.core_type<tc>, window_params = [{transform_indices = @transform_0, window_bounds = array<i64: 8, 1>}, {transform_indices = @transform_1, window_bounds = array<i64: 8, 4>}, {pipeline_mode = #tpu.pipeline_mode<synchronous>, transform_indices = @transform_2, window_bounds = array<i64: 1, 128>}, {pipeline_mode = #tpu.pipeline_mode<synchronous>, transform_indices = @transform_3, window_bounds = array<i64: 128, 128>}, {pipeline_mode = #tpu.pipeline_mode<synchronous>, transform_indices = @transform_4, window_bounds = array<i64: 1, 128>}, {pipeline_mode = #tpu.pipeline_mode<synchronous>, transform_indices = @transform_5, window_bounds = array<i64: 128, 128>}, {pipeline_mode = #tpu.pipeline_mode<synchronous>, transform_indices = @transform_6, window_bounds = array<i64: 4, 128>}, {pipeline_mode = #tpu.pipeline_mode<synchronous>, transform_indices = @transform_7, window_bounds = array<i64: 1, 128>}, {pipeline_mode = #tpu.pipeline_mode<synchronous>, transform_indices = @transform_8, window_bounds = array<i64: 128, 128>}, {pipeline_mode = #tpu.pipeline_mode<synchronous>, transform_indices = @transform_9, window_bounds = array<i64: 1, 128>}, {pipeline_mode = #tpu.pipeline_mode<synchronous>, transform_indices = @transform_10, window_bounds = array<i64: 128, 128>}, {pipeline_mode = #tpu.pipeline_mode<synchronous>, transform_indices = @transform_11, window_bounds = array<i64: 1, 128>}, {transform_indices = @transform_12, window_bounds = array<i64: 8, 128>}]} {
    %c0 = arith.constant 0 : index
    %c0_0 = arith.constant 0 : index
    %0 = vector.load %arg1[%c0, %c0_0] : memref<8x1xf32, #tpu.memory_space<vmem>>, vector<8x1xf32>
    %c0_1 = arith.constant 0 : index
    %c0_2 = arith.constant 0 : index
    %1 = vector.load %arg3[%c0_1, %c0_2] : memref<1x128xf32, #tpu.memory_space<vmem>>, vector<1x128xf32>
    %2 = vector.broadcast %0 : vector<8x1xf32> to vector<8x128xf32>
    %3 = vector.broadcast %1 : vector<1x128xf32> to vector<8x128xf32>
    %4 = arith.mulf %2, %3 : vector<8x128xf32>
    %5 = tpu.iota {dimensions = array<i32: 1>} : vector<8x128xi32>
    %c64_i32 = arith.constant 64 : i32
    %6 = vector.broadcast %c64_i32 : i32 to vector<8x128xi32>
    %7 = arith.cmpi slt, %5, %6 : vector<8x128xi32>
    %8 = math.cos %4 : vector<8x128xf32>
    %c128_i32 = arith.constant 128 : i32
    %9 = vector.broadcast %c128_i32 : i32 to vector<8x128xi32>
    %10 = arith.cmpi slt, %5, %9 : vector<8x128xi32>
    %11 = math.sin %4 : vector<8x128xf32>
    %cst = arith.constant 0.000000e+00 : f32
    %12 = vector.broadcast %cst : f32 to vector<8x128xf32>
    %13 = arith.select %10, %11, %12 : vector<8x128xi1>, vector<8x128xf32>
    %14 = arith.select %7, %8, %13 : vector<8x128xi1>, vector<8x128xf32>
    %c0_3 = arith.constant 0 : index
    %c0_4 = arith.constant 0 : index
    %15 = vector.load %arg4[%c0_3, %c0_4] : memref<128x128xf32, #tpu.memory_space<vmem>>, vector<128x128xf32>
    %cst_5 = arith.constant dense<0.000000e+00> : vector<8x128xf32>
    %16 = tpu.matmul %14, %15, %cst_5 {dimension_numbers = #tpu.dot_dimension_numbers<[1], [0], [0], [1], [0, 0, 1, 1], [], []>} : vector<8x128xf32>, vector<128x128xf32>, vector<8x128xf32> -> vector<8x128xf32>
    %c0_6 = arith.constant 0 : index
    %c0_7 = arith.constant 0 : index
    %17 = vector.load %arg5[%c0_6, %c0_7] : memref<1x128xf32, #tpu.memory_space<vmem>>, vector<1x128xf32>
    %18 = vector.broadcast %17 : vector<1x128xf32> to vector<8x128xf32>
    %19 = arith.addf %16, %18 : vector<8x128xf32>
    %20 = arith.negf %19 : vector<8x128xf32>
    %21 = math.exp %20 : vector<8x128xf32>
    %cst_8 = arith.constant 1.000000e+00 : f32
    %22 = vector.broadcast %cst_8 : f32 to vector<8x128xf32>
    %23 = arith.addf %22, %21 : vector<8x128xf32>
    %24 = arith.divf %22, %23 : vector<8x128xf32>
    %25 = arith.mulf %19, %24 : vector<8x128xf32>
    %c0_9 = arith.constant 0 : index
    %c0_10 = arith.constant 0 : index
    %26 = vector.load %arg6[%c0_9, %c0_10] : memref<128x128xf32, #tpu.memory_space<vmem>>, vector<128x128xf32>
    %cst_11 = arith.constant dense<0.000000e+00> : vector<8x128xf32>
    %27 = tpu.matmul %25, %26, %cst_11 {dimension_numbers = #tpu.dot_dimension_numbers<[1], [0], [0], [1], [0, 0, 1, 1], [], []>} : vector<8x128xf32>, vector<128x128xf32>, vector<8x128xf32> -> vector<8x128xf32>
    %c0_12 = arith.constant 0 : index
    %c0_13 = arith.constant 0 : index
    %28 = vector.load %arg2[%c0_12, %c0_13] : memref<8x4xf32, #tpu.memory_space<vmem>>, vector<8x4xf32>
    %c0_14 = arith.constant 0 : index
    %c0_15 = arith.constant 0 : index
    %29 = vector.load %arg7[%c0_14, %c0_15] : memref<4x128xf32, #tpu.memory_space<vmem>>, vector<4x128xf32>
    %cst_16 = arith.constant dense<0.000000e+00> : vector<8x128xf32>
    %30 = tpu.matmul %28, %29, %cst_16 {dimension_numbers = #tpu.dot_dimension_numbers<[1], [0], [0], [1], [0, 0, 1, 1], [], []>} : vector<8x4xf32>, vector<4x128xf32>, vector<8x128xf32> -> vector<8x128xf32>
    %31 = arith.addf %27, %30 : vector<8x128xf32>
    %c0_17 = arith.constant 0 : index
    %c0_18 = arith.constant 0 : index
    %32 = vector.load %arg8[%c0_17, %c0_18] : memref<1x128xf32, #tpu.memory_space<vmem>>, vector<1x128xf32>
    %33 = vector.broadcast %32 : vector<1x128xf32> to vector<8x128xf32>
    %34 = arith.addf %31, %33 : vector<8x128xf32>
    %35 = arith.negf %34 : vector<8x128xf32>
    %36 = math.exp %35 : vector<8x128xf32>
    %cst_19 = arith.constant 1.000000e+00 : f32
    %37 = vector.broadcast %cst_19 : f32 to vector<8x128xf32>
    %38 = arith.addf %37, %36 : vector<8x128xf32>
    %39 = arith.divf %37, %38 : vector<8x128xf32>
    %40 = arith.mulf %34, %39 : vector<8x128xf32>
    %c0_20 = arith.constant 0 : index
    %c0_21 = arith.constant 0 : index
    %41 = vector.load %arg9[%c0_20, %c0_21] : memref<128x128xf32, #tpu.memory_space<vmem>>, vector<128x128xf32>
    %cst_22 = arith.constant dense<0.000000e+00> : vector<8x128xf32>
    %42 = tpu.matmul %40, %41, %cst_22 {dimension_numbers = #tpu.dot_dimension_numbers<[1], [0], [0], [1], [0, 0, 1, 1], [], []>} : vector<8x128xf32>, vector<128x128xf32>, vector<8x128xf32> -> vector<8x128xf32>
    %c0_23 = arith.constant 0 : index
    %c0_24 = arith.constant 0 : index
    %43 = vector.load %arg10[%c0_23, %c0_24] : memref<1x128xf32, #tpu.memory_space<vmem>>, vector<1x128xf32>
    %44 = vector.broadcast %43 : vector<1x128xf32> to vector<8x128xf32>
    %45 = arith.addf %42, %44 : vector<8x128xf32>
    %46 = arith.negf %45 : vector<8x128xf32>
    %47 = math.exp %46 : vector<8x128xf32>
    %cst_25 = arith.constant 1.000000e+00 : f32
    %48 = vector.broadcast %cst_25 : f32 to vector<8x128xf32>
    %49 = arith.addf %48, %47 : vector<8x128xf32>
    %50 = arith.divf %48, %49 : vector<8x128xf32>
    %51 = arith.mulf %45, %50 : vector<8x128xf32>
    %c0_26 = arith.constant 0 : index
    %c0_27 = arith.constant 0 : index
    %52 = vector.load %arg11[%c0_26, %c0_27] : memref<128x128xf32, #tpu.memory_space<vmem>>, vector<128x128xf32>
    %cst_28 = arith.constant dense<0.000000e+00> : vector<8x128xf32>
    %53 = tpu.matmul %51, %52, %cst_28 {dimension_numbers = #tpu.dot_dimension_numbers<[1], [0], [0], [1], [0, 0, 1, 1], [], []>} : vector<8x128xf32>, vector<128x128xf32>, vector<8x128xf32> -> vector<8x128xf32>
    %c0_29 = arith.constant 0 : index
    %c0_30 = arith.constant 0 : index
    %54 = vector.load %arg12[%c0_29, %c0_30] : memref<1x128xf32, #tpu.memory_space<vmem>>, vector<1x128xf32>
    %55 = vector.broadcast %54 : vector<1x128xf32> to vector<8x128xf32>
    %56 = arith.addf %53, %55 : vector<8x128xf32>
    %c0_31 = arith.constant 0 : index
    %c0_32 = arith.constant 0 : index
    %57 = vector.load %arg13[%c0_31, %c0_32] : memref<8x128xf32, #tpu.memory_space<vmem>>, vector<8x128xf32>
    tpu.vector_store %arg13[%c0_31, %c0_32], %56 {strides = array<i32>} : memref<8x128xf32, #tpu.memory_space<vmem>>, vector<8x128xf32>,
    return
  }
  func.func @transform_0(%arg0: i32) -> (i32, i32) {
    %c0_i32 = arith.constant 0 : i32
    %c0_i32_0 = arith.constant 0 : i32
    return %arg0, %c0_i32 : i32, i32
  }
  func.func @transform_1(%arg0: i32) -> (i32, i32) {
    %c0_i32 = arith.constant 0 : i32
    %c0_i32_0 = arith.constant 0 : i32
    return %arg0, %c0_i32 : i32, i32
  }
  func.func @transform_2(%arg0: i32) -> (i32, i32) {
    %c0_i32 = arith.constant 0 : i32
    %c0_i32_0 = arith.constant 0 : i32
    %c0_i32_1 = arith.constant 0 : i32
    return %c0_i32, %c0_i32_0 : i32, i32
  }
  func.func @transform_3(%arg0: i32) -> (i32, i32) {
    %c0_i32 = arith.constant 0 : i32
    %c0_i32_0 = arith.constant 0 : i32
    %c0_i32_1 = arith.constant 0 : i32
    return %c0_i32, %c0_i32_0 : i32, i32
  }
  func.func @transform_4(%arg0: i32) -> (i32, i32) {
    %c0_i32 = arith.constant 0 : i32
    %c0_i32_0 = arith.constant 0 : i32
    %c0_i32_1 = arith.constant 0 : i32
    return %c0_i32, %c0_i32_0 : i32, i32
  }
  func.func @transform_5(%arg0: i32) -> (i32, i32) {
    %c0_i32 = arith.constant 0 : i32
    %c0_i32_0 = arith.constant 0 : i32
    %c0_i32_1 = arith.constant 0 : i32
    return %c0_i32, %c0_i32_0 : i32, i32
  }
  func.func @transform_6(%arg0: i32) -> (i32, i32) {
    %c0_i32 = arith.constant 0 : i32
    %c0_i32_0 = arith.constant 0 : i32
    %c0_i32_1 = arith.constant 0 : i32
    return %c0_i32, %c0_i32_0 : i32, i32
  }
  func.func @transform_7(%arg0: i32) -> (i32, i32) {
    %c0_i32 = arith.constant 0 : i32
    %c0_i32_0 = arith.constant 0 : i32
    %c0_i32_1 = arith.constant 0 : i32
    return %c0_i32, %c0_i32_0 : i32, i32
  }
  func.func @transform_8(%arg0: i32) -> (i32, i32) {
    %c0_i32 = arith.constant 0 : i32
    %c0_i32_0 = arith.constant 0 : i32
    %c0_i32_1 = arith.constant 0 : i32
    return %c0_i32, %c0_i32_0 : i32, i32
  }
  func.func @transform_9(%arg0: i32) -> (i32, i32) {
    %c0_i32 = arith.constant 0 : i32
    %c0_i32_0 = arith.constant 0 : i32
    %c0_i32_1 = arith.constant 0 : i32
    return %c0_i32, %c0_i32_0 : i32, i32
  }
  func.func @transform_10(%arg0: i32) -> (i32, i32) {
    %c0_i32 = arith.constant 0 : i32
    %c0_i32_0 = arith.constant 0 : i32
    %c0_i32_1 = arith.constant 0 : i32
    return %c0_i32, %c0_i32_0 : i32, i32
  }
  func.func @transform_11(%arg0: i32) -> (i32, i32) {
    %c0_i32 = arith.constant 0 : i32
    %c0_i32_0 = arith.constant 0 : i32
    %c0_i32_1 = arith.constant 0 : i32
    return %c0_i32, %c0_i32_0 : i32, i32
  }
  func.func @transform_12(%arg0: i32) -> (i32, i32) {
    %c0_i32 = arith.constant 0 : i32
    %c0_i32_0 = arith.constant 0 : i32
    return %arg0, %c0_i32 : i32, i32
  }
}

module attributes {stable_mosaic.version = 11 : i64} {
  func.func @kernel(%arg0: i32, %arg1: memref<8x1xf32, #tpu.memory_space<vmem>>, %arg2: memref<8x4xf32, #tpu.memory_space<vmem>>, %arg3: memref<1x128xf32, #tpu.memory_space<vmem>>, %arg4: memref<128x128xf32, #tpu.memory_space<vmem>>, %arg5: memref<1x128xf32, #tpu.memory_space<vmem>>, %arg6: memref<128x128xf32, #tpu.memory_space<vmem>>, %arg7: memref<4x128xf32, #tpu.memory_space<vmem>>, %arg8: memref<1x128xf32, #tpu.memory_space<vmem>>, %arg9: memref<128x128xf32, #tpu.memory_space<vmem>>, %arg10: memref<1x128xf32, #tpu.memory_space<vmem>>, %arg11: memref<128x128xf32, #tpu.memory_space<vmem>>, %arg12: memref<1x128xf32, #tpu.memory_space<vmem>>, %arg13: memref<8x128xf32, #tpu.memory_space<vmem>>) attributes {dimension_semantics = [#tpu.dimension_semantics<parallel>], iteration_bounds = array<i64: 1>, scalar_prefetch = 0 : i64, scratch_operands = 0 : i64, tpu.core_type = #tpu.core_type<tc>, window_params = [{transform_indices = @transform_0, window_bounds = array<i64: 8, 1>}, {transform_indices = @transform_1, window_bounds = array<i64: 8, 4>}, {pipeline_mode = #tpu.pipeline_mode<synchronous>, transform_indices = @transform_2, window_bounds = array<i64: 1, 128>}, {pipeline_mode = #tpu.pipeline_mode<synchronous>, transform_indices = @transform_3, window_bounds = array<i64: 128, 128>}, {pipeline_mode = #tpu.pipeline_mode<synchronous>, transform_indices = @transform_4, window_bounds = array<i64: 1, 128>}, {pipeline_mode = #tpu.pipeline_mode<synchronous>, transform_indices = @transform_5, window_bounds = array<i64: 128, 128>}, {pipeline_mode = #tpu.pipeline_mode<synchronous>, transform_indices = @transform_6, window_bounds = array<i64: 4, 128>}, {pipeline_mode = #tpu.pipeline_mode<synchronous>, transform_indices = @transform_7, window_bounds = array<i64: 1, 128>}, {pipeline_mode = #tpu.pipeline_mode<synchronous>, transform_indices = @transform_8, window_bounds = array<i64: 128, 128>}, {pipeline_mode = #tpu.pipeline_mode<synchronous>, transform_indices = @transform_9, window_bounds = array<i64: 1, 128>}, {pipeline_mode = #tpu.pipeline_mode<synchronous>, transform_indices = @transform_10, window_bounds = array<i64: 128, 128>}, {pipeline_mode = #tpu.pipeline_mode<synchronous>, transform_indices = @transform_11, window_bounds = array<i64: 1, 128>}, {transform_indices = @transform_12, window_bounds = array<i64: 8, 128>}]} {
    %c0 = arith.constant 0 : index
    %c0_0 = arith.constant 0 : index
    %0 = vector.load %arg1[%c0, %c0_0] : memref<8x1xf32, #tpu.memory_space<vmem>>, vector<8x1xf32>
    %c0_1 = arith.constant 0 : index
    %c0_2 = arith.constant 0 : index
    %1 = vector.load %arg3[%c0_1, %c0_2] : memref<1x128xf32, #tpu.memory_space<vmem>>, vector<1x128xf32>
    %2 = vector.broadcast %0 : vector<8x1xf32> to vector<8x128xf32>
    %3 = vector.broadcast %1 : vector<1x128xf32> to vector<8x128xf32>
    %4 = arith.mulf %2, %3 : vector<8x128xf32>
    %5 = tpu.iota {dimensions = array<i32: 1>} : vector<8x128xi32>
    %c64_i32 = arith.constant 64 : i32
    %6 = vector.broadcast %c64_i32 : i32 to vector<8x128xi32>
    %7 = arith.cmpi slt, %5, %6 : vector<8x128xi32>
    %8 = math.cos %4 : vector<8x128xf32>
    %c128_i32 = arith.constant 128 : i32
    %9 = vector.broadcast %c128_i32 : i32 to vector<8x128xi32>
    %10 = arith.cmpi slt, %5, %9 : vector<8x128xi32>
    %11 = math.sin %4 : vector<8x128xf32>
    %cst = arith.constant 0.000000e+00 : f32
    %12 = vector.broadcast %cst : f32 to vector<8x128xf32>
    %13 = arith.select %10, %11, %12 : vector<8x128xi1>, vector<8x128xf32>
    %14 = arith.select %7, %8, %13 : vector<8x128xi1>, vector<8x128xf32>
    %c0_3 = arith.constant 0 : index
    %c0_4 = arith.constant 0 : index
    %15 = vector.load %arg4[%c0_3, %c0_4] : memref<128x128xf32, #tpu.memory_space<vmem>>, vector<128x128xf32>
    %cst_5 = arith.constant dense<0.000000e+00> : vector<8x128xf32>
    %16 = tpu.matmul %14, %15, %cst_5 {dimension_numbers = #tpu.dot_dimension_numbers<[1], [0], [0], [1], [0, 0, 1, 1], [], []>} : vector<8x128xf32>, vector<128x128xf32>, vector<8x128xf32> -> vector<8x128xf32>
    %c0_6 = arith.constant 0 : index
    %c0_7 = arith.constant 0 : index
    %17 = vector.load %arg5[%c0_6, %c0_7] : memref<1x128xf32, #tpu.memory_space<vmem>>, vector<1x128xf32>
    %18 = vector.broadcast %17 : vector<1x128xf32> to vector<8x128xf32>
    %19 = arith.addf %16, %18 : vector<8x128xf32>
    %20 = arith.negf %19 : vector<8x128xf32>
    %21 = math.exp %20 : vector<8x128xf32>
    %cst_8 = arith.constant 1.000000e+00 : f32
    %22 = vector.broadcast %cst_8 : f32 to vector<8x128xf32>
    %23 = arith.addf %22, %21 : vector<8x128xf32>
    %24 = arith.divf %22, %23 : vector<8x128xf32>
    %25 = arith.mulf %19, %24 : vector<8x128xf32>
    %c0_9 = arith.constant 0 : index
    %c0_10 = arith.constant 0 : index
    %26 = vector.load %arg6[%c0_9, %c0_10] : memref<128x128xf32, #tpu.memory_space<vmem>>, vector<128x128xf32>
    %cst_11 = arith.constant dense<0.000000e+00> : vector<8x128xf32>
    %27 = tpu.matmul %25, %26, %cst_11 {dimension_numbers = #tpu.dot_dimension_numbers<[1], [0], [0], [1], [0, 0, 1, 1], [], []>} : vector<8x128xf32>, vector<128x128xf32>, vector<8x128xf32> -> vector<8x128xf32>
    %c0_12 = arith.constant 0 : index
    %c0_13 = arith.constant 0 : index
    %28 = vector.load %arg2[%c0_12, %c0_13] : memref<8x4xf32, #tpu.memory_space<vmem>>, vector<8x4xf32>
    %c0_14 = arith.constant 0 : index
    %c0_15 = arith.constant 0 : index
    %29 = vector.load %arg7[%c0_14, %c0_15] : memref<4x128xf32, #tpu.memory_space<vmem>>, vector<4x128xf32>
    %cst_16 = arith.constant dense<0.000000e+00> : vector<8x128xf32>
    %30 = tpu.matmul %28, %29, %cst_16 {dimension_numbers = #tpu.dot_dimension_numbers<[1], [0], [0], [1], [0, 0, 1, 1], [], []>} : vector<8x4xf32>, vector<4x128xf32>, vector<8x128xf32> -> vector<8x128xf32>
    %31 = arith.addf %27, %30 : vector<8x128xf32>
    %c0_17 = arith.constant 0 : index
    %c0_18 = arith.constant 0 : index
    %32 = vector.load %arg8[%c0_17, %c0_18] : memref<1x128xf32, #tpu.memory_space<vmem>>, vector<1x128xf32>
    %33 = vector.broadcast %32 : vector<1x128xf32> to vector<8x128xf32>
    %34 = arith.addf %31, %33 : vector<8x128xf32>
    %35 = arith.negf %34 : vector<8x128xf32>
    %36 = math.exp %35 : vector<8x128xf32>
    %cst_19 = arith.constant 1.000000e+00 : f32
    %37 = vector.broadcast %cst_19 : f32 to vector<8x128xf32>
    %38 = arith.addf %37, %36 : vector<8x128xf32>
    %39 = arith.divf %37, %38 : vector<8x128xf32>
    %40 = arith.mulf %34, %39 : vector<8x128xf32>
    %c0_20 = arith.constant 0 : index
    %c0_21 = arith.constant 0 : index
    %41 = vector.load %arg9[%c0_20, %c0_21] : memref<128x128xf32, #tpu.memory_space<vmem>>, vector<128x128xf32>
    %cst_22 = arith.constant dense<0.000000e+00> : vector<8x128xf32>
    %42 = tpu.matmul %40, %41, %cst_22 {dimension_numbers = #tpu.dot_dimension_numbers<[1], [0], [0], [1], [0, 0, 1, 1], [], []>} : vector<8x128xf32>, vector<128x128xf32>, vector<8x128xf32> -> vector<8x128xf32>
    %c0_23 = arith.constant 0 : index
    %c0_24 = arith.constant 0 : index
    %43 = vector.load %arg10[%c0_23, %c0_24] : memref<1x128xf32, #tpu.memory_space<vmem>>, vector<1x128xf32>
    %44 = vector.broadcast %43 : vector<1x128xf32> to vector<8x128xf32>
    %45 = arith.addf %42, %44 : vector<8x128xf32>
    %46 = arith.negf %45 : vector<8x128xf32>
    %47 = math.exp %46 : vector<8x128xf32>
    %cst_25 = arith.constant 1.000000e+00 : f32
    %48 = vector.broadcast %cst_25 : f32 to vector<8x128xf32>
    %49 = arith.addf %48, %47 : vector<8x128xf32>
    %50 = arith.divf %48, %49 : vector<8x128xf32>
    %51 = arith.mulf %45, %50 : vector<8x128xf32>
    %c0_26 = arith.constant 0 : index
    %c0_27 = arith.constant 0 : index
    %52 = vector.load %arg11[%c0_26, %c0_27] : memref<128x128xf32, #tpu.memory_space<vmem>>, vector<128x128xf32>
    %cst_28 = arith.constant dense<0.000000e+00> : vector<8x128xf32>
    %53 = tpu.matmul %51, %52, %cst_28 {dimension_numbers = #tpu.dot_dimension_numbers<[1], [0], [0], [1], [0, 0, 1, 1], [], []>} : vector<8x128xf32>, vector<128x128xf32>, vector<8x128xf32> -> vector<8x128xf32>
    %c0_29 = arith.constant 0 : index
    %c0_30 = arith.constant 0 : index
    %54 = vector.load %arg12[%c0_29, %c0_30] : memref<1x128xf32, #tpu.memory_space<vmem>>, vector<1x128xf32>
    %55 = vector.broadcast %54 : vector<1x128xf32> to vector<8x128xf32>
    %56 = arith.addf %53, %55 : vector<8x128xf32>
    %c0_31 = arith.constant 0 : index
    %c0_32 = arith.constant 0 : index
    %57 = vector.load %arg13[%c0_31, %c0_32] : memref<8x128xf32, #tpu.memory_space<vmem>>, vector<8x128xf32>
    tpu.vector_store %arg13[%c0_31, %c0_32], %56 {strides = array<i32>} : memref<8x128xf32, #tpu.memory_space<vmem>>, vector<8x128xf32>,
    return
  }
  func.func @transform_0(%arg0: i32) -> (i32, i32) {
    %c0_i32 = arith.constant 0 : i32
    %c0_i32_0 = arith.constant 0 : i32
    return %arg0, %c0_i32 : i32, i32
  }
  func.func @transform_1(%arg0: i32) -> (i32, i32) {
    %c0_i32 = arith.constant 0 : i32
    %c0_i32_0 = arith.constant 0 : i32
    return %arg0, %c0_i32 : i32, i32
  }
  func.func @transform_2(%arg0: i32) -> (i32, i32) {
    %c0_i32 = arith.constant 0 : i32
    %c0_i32_0 = arith.constant 0 : i32
    %c0_i32_1 = arith.constant 0 : i32
    return %c0_i32, %c0_i32_0 : i32, i32
  }
  func.func @transform_3(%arg0: i32) -> (i32, i32) {
    %c0_i32 = arith.constant 0 : i32
    %c0_i32_0 = arith.constant 0 : i32
    %c0_i32_1 = arith.constant 0 : i32
    return %c0_i32, %c0_i32_0 : i32, i32
  }
  func.func @transform_4(%arg0: i32) -> (i32, i32) {
    %c0_i32 = arith.constant 0 : i32
    %c0_i32_0 = arith.constant 0 : i32
    %c0_i32_1 = arith.constant 0 : i32
    return %c0_i32, %c0_i32_0 : i32, i32
  }
  func.func @transform_5(%arg0: i32) -> (i32, i32) {
    %c0_i32 = arith.constant 0 : i32
    %c0_i32_0 = arith.constant 0 : i32
    %c0_i32_1 = arith.constant 0 : i32
    return %c0_i32, %c0_i32_0 : i32, i32
  }
  func.func @transform_6(%arg0: i32) -> (i32, i32) {
    %c0_i32 = arith.constant 0 : i32
    %c0_i32_0 = arith.constant 0 : i32
    %c0_i32_1 = arith.constant 0 : i32
    return %c0_i32, %c0_i32_0 : i32, i32
  }
  func.func @transform_7(%arg0: i32) -> (i32, i32) {
    %c0_i32 = arith.constant 0 : i32
    %c0_i32_0 = arith.constant 0 : i32
    %c0_i32_1 = arith.constant 0 : i32
    return %c0_i32, %c0_i32_0 : i32, i32
  }
  func.func @transform_8(%arg0: i32) -> (i32, i32) {
    %c0_i32 = arith.constant 0 : i32
    %c0_i32_0 = arith.constant 0 : i32
    %c0_i32_1 = arith.constant 0 : i32
    return %c0_i32, %c0_i32_0 : i32, i32
  }
  func.func @transform_9(%arg0: i32) -> (i32, i32) {
    %c0_i32 = arith.constant 0 : i32
    %c0_i32_0 = arith.constant 0 : i32
    %c0_i32_1 = arith.constant 0 : i32
    return %c0_i32, %c0_i32_0 : i32, i32
  }
  func.func @transform_10(%arg0: i32) -> (i32, i32) {
    %c0_i32 = arith.constant 0 : i32
    %c0_i32_0 = arith.constant 0 : i32
    %c0_i32_1 = arith.constant 0 : i32
    return %c0_i32, %c0_i32_0 : i32, i32
  }
  func.func @transform_11(%arg0: i32) -> (i32, i32) {
    %c0_i32 = arith.constant 0 : i32
    %c0_i32_0 = arith.constant 0 : i32
    %c0_i32_1 = arith.constant 0 : i32
    return %c0_i32, %c0_i32_0 : i32, i32
  }
  func.func @transform_12(%arg0: i32) -> (i32, i32) {
    %c0_i32 = arith.constant 0 : i32
    %c0_i32_0 = arith.constant 0 : i32
    return %arg0, %c0_i32 : i32, i32
  }
}

module attributes {stable_mosaic.version = 11 : i64} {
  func.func @kernel(%arg0: i32, %arg1: memref<8x128xf32, #tpu.memory_space<vmem>>, %arg2: memref<8x128xf32, #tpu.memory_space<vmem>>, %arg3: memref<128x128xf32, #tpu.memory_space<vmem>>, %arg4: memref<1x128xf32, #tpu.memory_space<vmem>>, %arg5: memref<256x128xf32, #tpu.memory_space<vmem>>, %arg6: memref<1x128xf32, #tpu.memory_space<vmem>>, %arg7: memref<128x128xf32, #tpu.memory_space<vmem>>, %arg8: memref<1x128xf32, #tpu.memory_space<vmem>>, %arg9: memref<128x128xf32, #tpu.memory_space<vmem>>, %arg10: memref<1x128xf32, #tpu.memory_space<vmem>>, %arg11: memref<8x128xf32, #tpu.memory_space<vmem>>) attributes {dimension_semantics = [#tpu.dimension_semantics<parallel>], iteration_bounds = array<i64: 1>, scalar_prefetch = 0 : i64, scratch_operands = 0 : i64, tpu.core_type = #tpu.core_type<tc>, window_params = [{transform_indices = @transform_0, window_bounds = array<i64: 8, 128>}, {transform_indices = @transform_1, window_bounds = array<i64: 8, 128>}, {pipeline_mode = #tpu.pipeline_mode<synchronous>, transform_indices = @transform_2, window_bounds = array<i64: 128, 128>}, {pipeline_mode = #tpu.pipeline_mode<synchronous>, transform_indices = @transform_3, window_bounds = array<i64: 1, 128>}, {pipeline_mode = #tpu.pipeline_mode<synchronous>, transform_indices = @transform_4, window_bounds = array<i64: 256, 128>}, {pipeline_mode = #tpu.pipeline_mode<synchronous>, transform_indices = @transform_5, window_bounds = array<i64: 1, 128>}, {pipeline_mode = #tpu.pipeline_mode<synchronous>, transform_indices = @transform_6, window_bounds = array<i64: 128, 128>}, {pipeline_mode = #tpu.pipeline_mode<synchronous>, transform_indices = @transform_7, window_bounds = array<i64: 1, 128>}, {pipeline_mode = #tpu.pipeline_mode<synchronous>, transform_indices = @transform_8, window_bounds = array<i64: 128, 128>}, {pipeline_mode = #tpu.pipeline_mode<synchronous>, transform_indices = @transform_9, window_bounds = array<i64: 1, 128>}, {transform_indices = @transform_10, window_bounds = array<i64: 8, 128>}]} {
    %c0 = arith.constant 0 : index
    %c0_0 = arith.constant 0 : index
    %0 = vector.load %arg1[%c0, %c0_0] : memref<8x128xf32, #tpu.memory_space<vmem>>, vector<8x128xf32>
    %c0_1 = arith.constant 0 : index
    %c0_2 = arith.constant 0 : index
    %1 = vector.load %arg3[%c0_1, %c0_2] : memref<128x128xf32, #tpu.memory_space<vmem>>, vector<128x128xf32>
    %cst = arith.constant dense<0.000000e+00> : vector<8x128xf32>
    %2 = tpu.matmul %0, %1, %cst {dimension_numbers = #tpu.dot_dimension_numbers<[1], [0], [0], [1], [0, 0, 1, 1], [], []>} : vector<8x128xf32>, vector<128x128xf32>, vector<8x128xf32> -> vector<8x128xf32>
    %c0_3 = arith.constant 0 : index
    %c0_4 = arith.constant 0 : index
    %3 = vector.load %arg4[%c0_3, %c0_4] : memref<1x128xf32, #tpu.memory_space<vmem>>, vector<1x128xf32>
    %4 = vector.broadcast %3 : vector<1x128xf32> to vector<8x128xf32>
    %5 = arith.addf %2, %4 : vector<8x128xf32>
    %6 = arith.negf %5 : vector<8x128xf32>
    %7 = math.exp %6 : vector<8x128xf32>
    %cst_5 = arith.constant 1.000000e+00 : f32
    %8 = vector.broadcast %cst_5 : f32 to vector<8x128xf32>
    %9 = arith.addf %8, %7 : vector<8x128xf32>
    %10 = arith.divf %8, %9 : vector<8x128xf32>
    %11 = arith.mulf %5, %10 : vector<8x128xf32>
    %c0_6 = arith.constant 0 : index
    %c0_7 = arith.constant 0 : index
    %12 = vector.load %arg2[%c0_6, %c0_7] : memref<8x128xf32, #tpu.memory_space<vmem>>, vector<8x128xf32>
    %13 = tpu.concatenate %12, %11 in 1 : vector<8x128xf32>, vector<8x128xf32> -> vector<8x256xf32>
    %c0_8 = arith.constant 0 : index
    %c0_9 = arith.constant 0 : index
    %14 = vector.load %arg5[%c0_8, %c0_9] : memref<256x128xf32, #tpu.memory_space<vmem>>, vector<256x128xf32>
    %cst_10 = arith.constant dense<0.000000e+00> : vector<8x128xf32>
    %15 = tpu.matmul %13, %14, %cst_10 {dimension_numbers = #tpu.dot_dimension_numbers<[1], [0], [0], [1], [0, 0, 1, 1], [], []>} : vector<8x256xf32>, vector<256x128xf32>, vector<8x128xf32> -> vector<8x128xf32>
    %c0_11 = arith.constant 0 : index
    %c0_12 = arith.constant 0 : index
    %16 = vector.load %arg6[%c0_11, %c0_12] : memref<1x128xf32, #tpu.memory_space<vmem>>, vector<1x128xf32>
    %17 = vector.broadcast %16 : vector<1x128xf32> to vector<8x128xf32>
    %18 = arith.addf %15, %17 : vector<8x128xf32>
    %19 = arith.negf %18 : vector<8x128xf32>
    %20 = math.exp %19 : vector<8x128xf32>
    %cst_13 = arith.constant 1.000000e+00 : f32
    %21 = vector.broadcast %cst_13 : f32 to vector<8x128xf32>
    %22 = arith.addf %21, %20 : vector<8x128xf32>
    %23 = arith.divf %21, %22 : vector<8x128xf32>
    %24 = arith.mulf %18, %23 : vector<8x128xf32>
    %c0_14 = arith.constant 0 : index
    %c0_15 = arith.constant 0 : index
    %25 = vector.load %arg7[%c0_14, %c0_15] : memref<128x128xf32, #tpu.memory_space<vmem>>, vector<128x128xf32>
    %cst_16 = arith.constant dense<0.000000e+00> : vector<8x128xf32>
    %26 = tpu.matmul %24, %25, %cst_16 {dimension_numbers = #tpu.dot_dimension_numbers<[1], [0], [0], [1], [0, 0, 1, 1], [], []>} : vector<8x128xf32>, vector<128x128xf32>, vector<8x128xf32> -> vector<8x128xf32>
    %c0_17 = arith.constant 0 : index
    %c0_18 = arith.constant 0 : index
    %27 = vector.load %arg8[%c0_17, %c0_18] : memref<1x128xf32, #tpu.memory_space<vmem>>, vector<1x128xf32>
    %28 = vector.broadcast %27 : vector<1x128xf32> to vector<8x128xf32>
    %29 = arith.addf %26, %28 : vector<8x128xf32>
    %30 = arith.negf %29 : vector<8x128xf32>
    %31 = math.exp %30 : vector<8x128xf32>
    %cst_19 = arith.constant 1.000000e+00 : f32
    %32 = vector.broadcast %cst_19 : f32 to vector<8x128xf32>
    %33 = arith.addf %32, %31 : vector<8x128xf32>
    %34 = arith.divf %32, %33 : vector<8x128xf32>
    %35 = arith.mulf %29, %34 : vector<8x128xf32>
    %c0_20 = arith.constant 0 : index
    %c0_21 = arith.constant 0 : index
    %36 = vector.load %arg9[%c0_20, %c0_21] : memref<128x128xf32, #tpu.memory_space<vmem>>, vector<128x128xf32>
    %cst_22 = arith.constant dense<0.000000e+00> : vector<8x128xf32>
    %37 = tpu.matmul %35, %36, %cst_22 {dimension_numbers = #tpu.dot_dimension_numbers<[1], [0], [0], [1], [0, 0, 1, 1], [], []>} : vector<8x128xf32>, vector<128x128xf32>, vector<8x128xf32> -> vector<8x128xf32>
    %c0_23 = arith.constant 0 : index
    %c0_24 = arith.constant 0 : index
    %38 = vector.load %arg10[%c0_23, %c0_24] : memref<1x128xf32, #tpu.memory_space<vmem>>, vector<1x128xf32>
    %39 = vector.broadcast %38 : vector<1x128xf32> to vector<8x128xf32>
    %40 = arith.addf %37, %39 : vector<8x128xf32>
    %c0_25 = arith.constant 0 : index
    %c0_26 = arith.constant 0 : index
    %41 = vector.load %arg11[%c0_25, %c0_26] : memref<8x128xf32, #tpu.memory_space<vmem>>, vector<8x128xf32>
    tpu.vector_store %arg11[%c0_25, %c0_26], %40 {strides = array<i32>} : memref<8x128xf32, #tpu.memory_space<vmem>>, vector<8x128xf32>,
    return
  }
  func.func @transform_0(%arg0: i32) -> (i32, i32) {
    %c0_i32 = arith.constant 0 : i32
    %c0_i32_0 = arith.constant 0 : i32
    return %arg0, %c0_i32 : i32, i32
  }
  func.func @transform_1(%arg0: i32) -> (i32, i32) {
    %c0_i32 = arith.constant 0 : i32
    %c0_i32_0 = arith.constant 0 : i32
    return %arg0, %c0_i32 : i32, i32
  }
  func.func @transform_2(%arg0: i32) -> (i32, i32) {
    %c0_i32 = arith.constant 0 : i32
    %c0_i32_0 = arith.constant 0 : i32
    %c0_i32_1 = arith.constant 0 : i32
    return %c0_i32, %c0_i32_0 : i32, i32
  }
  func.func @transform_3(%arg0: i32) -> (i32, i32) {
    %c0_i32 = arith.constant 0 : i32
    %c0_i32_0 = arith.constant 0 : i32
    %c0_i32_1 = arith.constant 0 : i32
    return %c0_i32, %c0_i32_0 : i32, i32
  }
  func.func @transform_4(%arg0: i32) -> (i32, i32) {
    %c0_i32 = arith.constant 0 : i32
    %c0_i32_0 = arith.constant 0 : i32
    %c0_i32_1 = arith.constant 0 : i32
    return %c0_i32, %c0_i32_0 : i32, i32
  }
  func.func @transform_5(%arg0: i32) -> (i32, i32) {
    %c0_i32 = arith.constant 0 : i32
    %c0_i32_0 = arith.constant 0 : i32
    %c0_i32_1 = arith.constant 0 : i32
    return %c0_i32, %c0_i32_0 : i32, i32
  }
  func.func @transform_6(%arg0: i32) -> (i32, i32) {
    %c0_i32 = arith.constant 0 : i32
    %c0_i32_0 = arith.constant 0 : i32
    %c0_i32_1 = arith.constant 0 : i32
    return %c0_i32, %c0_i32_0 : i32, i32
  }
  func.func @transform_7(%arg0: i32) -> (i32, i32) {
    %c0_i32 = arith.constant 0 : i32
    %c0_i32_0 = arith.constant 0 : i32
    %c0_i32_1 = arith.constant 0 : i32
    return %c0_i32, %c0_i32_0 : i32, i32
  }
  func.func @transform_8(%arg0: i32) -> (i32, i32) {
    %c0_i32 = arith.constant 0 : i32
    %c0_i32_0 = arith.constant 0 : i32
    %c0_i32_1 = arith.constant 0 : i32
    return %c0_i32, %c0_i32_0 : i32, i32
  }
  func.func @transform_9(%arg0: i32) -> (i32, i32) {
    %c0_i32 = arith.constant 0 : i32
    %c0_i32_0 = arith.constant 0 : i32
    %c0_i32_1 = arith.constant 0 : i32
    return %c0_i32, %c0_i32_0 : i32, i32
  }
  func.func @transform_10(%arg0: i32) -> (i32, i32) {
    %c0_i32 = arith.constant 0 : i32
    %c0_i32_0 = arith.constant 0 : i32
    return %arg0, %c0_i32 : i32, i32
  }
}

</mosaic_0001>

<bundles_post_ra>
// kernel: tpu_custom_call.1
= control target key start
LH: loop header
LB: loop body
LE: loop exit
PB: predicated region body
PF: predicated region fallthrough
CT: control target
= control target key end

     0   :  { %17 = vsyncpa [#allocation3], 0  ;;  %s1558_s0 = inlined_call_operand.vmem [shape: f32[8,1], index: 0, kind: input, shape index: {}]   ;;  %s1559_s1 = inlined_call_operand.vmem [shape: f32[8,4], index: 1, kind: input, shape index: {}]   ;;  %s1560_s2 = inlined_call_operand.vmem [shape: f32[1,128], index: 2, kind: input, shape index: {}]   ;;  %s1561_s3 = inlined_call_operand.hbm [shape: f32[128,128], index: 3, kind: input, shape index: {}]   ;;  %s1562_s4 = inlined_call_operand.vmem [shape: f32[1,128], index: 4, kind: input, shape index: {}]   ;;  %s1563_s5 = inlined_call_operand.hbm [shape: f32[128,128], index: 5, kind: input, shape index: {}]   ;;  %s1564_s6 = inlined_call_operand.vmem [shape: f32[4,128], index: 6, kind: input, shape index: {}]   ;;  %s1565_s7 = inlined_call_operand.vmem [shape: f32[1,128], index: 7, kind: input, shape index: {}]   ;;  %s1566_s8 = inlined_call_operand.hbm [shape: f32[128,128], index: 8, kind: input, shape index: {}]   ;;  %s1567_s9 = inlined_call_operand.vmem [shape: f32[1,128], index: 9, kind: input, shape index: {}]   ;;  %s1568_s10 = inlined_call_operand.hbm [shape: f32[128,128], index: 10, kind: input, shape index: {}]   ;;  %s1569_s11 = inlined_call_operand.vmem [shape: f32[1,128], index: 11, kind: input, shape index: {}]   ;;  %s1570_s12 = inlined_call_operand.hbm [shape: f32[8,128], index: 12, kind: output, shape index: {}]  }
   0x1   :  { %18 = vsyncpa [#allocation6], 0 }
   0x2   :  { %19 = vsyncpa [#allocation9], 0 }
   0x3   :  { %20 = vsyncpa [#allocation4], 0  ;;  %s1301_s21 = smov [#allocation5]   ;;  %s1302_s23 = smov [#allocation2]  }
   0x4   :  { %s46_s22 = sshll.u32 %s1301_s21, 4  ;;  %s32_s24 = sshll.u32 %s1302_s23, 4  ;;  %s47_s22 = int_to_ptr.vmem [resolvable:$true] %s46_s22  ;;  %s1383_s24 = int_to_ptr.vmem [resolvable:$true] %s32_s24 }
   0x5   :  { %s1183_s27 = scalar_lea.hbm %s1563_s5, 2048 }
   0x6   :  { %p1184_p0 = scmp.ne.s32.totalorder %s1563_s5, %s1183_s27  ;;  %p1187_p1 = scmp.lt.u32.totalorder %s1183_s27, %s1563_s5 }
   0x8   :  { %p1189_p2 = pnand %p1187_p1, %p1184_p0 }
   0xa   :  { %1192 = shalt.err (!%p1189_p2)
}
   0xb   :  { %s1193_s14 = scalar_lea.vmem %s47_s22, 2048  ;;  %p1198_p4 = scmp.lt.s32.totalorder %s47_s22, %s47_s22 }
   0xc   :  { %p1194_p3 = scmp.ne.s32.totalorder %s47_s22, %s1193_s14  ;;  %p1199_p5 = scmp.lt.s32.totalorder %s1193_s14, %s1193_s14 }
   0xe   :  { %p1200_p6 = por %p1199_p5, %p1198_p4 }
  0x10   :  { %p1201_p7 = pnand %p1200_p6, %p1194_p3 }
  0x12   :  { %1204 = shalt.err (!%p1201_p7)
}
  0x13   :  { %s1303_s15 = smov 128   ;;  %s1304_s16 = smov 8  }
  0x14   :  { %52 = dma.hbm_to_vmem [thread:$0]  %s1563_s5, 2048, %s47_s22, [#allocation6], %s1303_s15, %s1303_s15, %s1304_s16  }
  0x15   :  { %s1205_s21 = scalar_lea.hbm %s1561_s3, 2048 }
  0x16   :  { %p1206_p8 = scmp.ne.s32.totalorder %s1561_s3, %s1205_s21  ;;  %p1209_p9 = scmp.lt.u32.totalorder %s1205_s21, %s1561_s3 }
  0x18   :  { %p1211_p10 = pnand %p1209_p9, %p1206_p8 }
  0x1a   :  { %1214 = shalt.err (!%p1211_p10)
}
  0x1b   :  { %s1215_s28 = scalar_lea.vmem %s1383_s24, 2048  ;;  %p1220_p12 = scmp.lt.s32.totalorder %s1383_s24, %s1383_s24 }
  0x1c   :  { %p1216_p11 = scmp.ne.s32.totalorder %s1383_s24, %s1215_s28  ;;  %p1221_p13 = scmp.lt.s32.totalorder %s1215_s28, %s1215_s28 }
  0x1e   :  { %p1222_p0 = por %p1221_p13, %p1220_p12 }
  0x20   :  { %p1223_p1 = pnand %p1222_p0, %p1216_p11 }
  0x22   :  { %1226 = shalt.err (!%p1223_p1)
}
  0x23   :  { %38 = dma.hbm_to_vmem [thread:$0]  %s1561_s3, 2048, %s1383_s24, [#allocation3], %s1303_s15, %s1303_s15, %s1304_s16  }
  0x24   :  { %s1305_s29 = smov [#allocation7]   ;;  %s1306_s13 = smov [#allocation8]  }
  0x25   :  { %s62_s30 = sshll.u32 %s1305_s29, 4  ;;  %s76_s14 = sshll.u32 %s1306_s13, 4  ;;  %s63_s30 = int_to_ptr.vmem [resolvable:$true] %s62_s30  ;;  %s1420_s14 = int_to_ptr.vmem [resolvable:$true] %s76_s14 }
  0x26   :  { %s1227_s19 = scalar_lea.hbm %s1566_s8, 2048 }
  0x27   :  { %p1228_p2 = scmp.ne.s32.totalorder %s1566_s8, %s1227_s19  ;;  %p1231_p3 = scmp.lt.u32.totalorder %s1227_s19, %s1566_s8 }
  0x29   :  { %p1233_p4 = pnand %p1231_p3, %p1228_p2 }
  0x2b   :  { %1236 = shalt.err (!%p1233_p4)
}
  0x2c   :  { %s1237_s3 = scalar_lea.vmem %s63_s30, 2048  ;;  %p1242_p6 = scmp.lt.s32.totalorder %s63_s30, %s63_s30 }
  0x2d   :  { %p1238_p5 = scmp.ne.s32.totalorder %s63_s30, %s1237_s3  ;;  %p1243_p7 = scmp.lt.s32.totalorder %s1237_s3, %s1237_s3 }
  0x2f   :  { %p1244_p8 = por %p1243_p7, %p1242_p6 }
  0x31   :  { %p1245_p9 = pnand %p1244_p8, %p1238_p5 }
  0x33   :  { %1248 = shalt.err (!%p1245_p9)
}
  0x34   :  { %68 = dma.hbm_to_vmem [thread:$0]  %s1566_s8, 2048, %s63_s30, [#allocation6], %s1303_s15, %s1303_s15, %s1304_s16  }
  0x35   :  { %s1249_s5 = scalar_lea.hbm %s1568_s10, 2048 }
  0x36   :  { %p1250_p10 = scmp.ne.s32.totalorder %s1568_s10, %s1249_s5  ;;  %p1253_p11 = scmp.lt.u32.totalorder %s1249_s5, %s1568_s10 }
  0x38   :  { %p1255_p12 = pnand %p1253_p11, %p1250_p10 }
  0x3a   :  { %1258 = shalt.err (!%p1255_p12)
}
  0x3b   :  { %s1259_s18 = scalar_lea.vmem %s1420_s14, 2048  ;;  %p1264_p0 = scmp.lt.s32.totalorder %s1420_s14, %s1420_s14 }
  0x3c   :  { %p1260_p13 = scmp.ne.s32.totalorder %s1420_s14, %s1259_s18  ;;  %p1265_p1 = scmp.lt.s32.totalorder %s1259_s18, %s1259_s18 }
  0x3e   :  { %p1266_p2 = por %p1265_p1, %p1264_p0 }
  0x40   :  { %p1267_p3 = pnand %p1266_p2, %p1260_p13 }
  0x42   :  { %1270 = shalt.err (!%p1267_p3)
}
  0x43   :  { %82 = dma.hbm_to_vmem [thread:$0]  %s1568_s10, 2048, %s1420_s14, [#allocation9], %s1303_s15, %s1303_s15, %s1304_s16  }
  0x44   :  { %1293 = dma.done.wait [#allocation3], 2048  }
  0x45   :  { %1294 = vsyncadd [#allocation3], 4294965248 }
  0x46   :  { %1295 = dma.done.wait [#allocation6], 4096  }
  0x47   :  { %1296 = vsyncadd [#allocation6], 4294963200 }
  0x48   :  { %1297 = dma.done.wait [#allocation9], 2048  }
  0x49   :  { %1298 = vsyncadd [#allocation9], 4294965248  ;;  %v1307_v0 = vmov 0   ;;  %v97_v1 = vld [vmem:[%s1558_s0] sm:$0xff]  ;;  %v324_v2 = vld [vmem:[#allocation2] sm:$0xff]  ;;  %v1308_v5 = vmov 0.0|0.0  }
  0x4a   :  { %1166 = vset.pattern.permute.xlu0 %v1307_v0  ;;  %v325_v3 = vld [vmem:[#allocation2 + $0x8] sm:$0xff]  ;;  %1049 = vmatprep.subr.bf16.mxu0 %v1308_v5  ;;  %v326_v6 = vld [vmem:[#allocation2 + $0x10] sm:$0xff]  ;;  %v327_v7 = vld [vmem:[#allocation2 + $0x18] sm:$0xff]  ;;  %vm1309_vm0 = vmmov 0   ;;  %v1310_v20 = vmov 0.0   ;;  %vm446_vm1 = vcmask 1043456  }
  0x4b   :  { %101 = vperm.xlu0 %1166, %v97_v1   ;;  %v1050_v4 = vpack.c.bf16 %v325_v3, %v324_v2  ;;  %v1053_v8 = vpack.c.bf16 %v327_v7, %v326_v6  ;;  %v328_v9 = vld [vmem:[#allocation2 + $0x20] sm:$0xff]  ;;  %v329_v10 = vld [vmem:[#allocation2 + $0x28] sm:$0xff]  ;;  %v330_v12 = vld [vmem:[#allocation2 + $0x30] sm:$0xff]  ;;  %936 = vmatprep.mubr.msk.f32.mxu0 %vm1309_vm0, %v1310_v20  ;;  %vm442_vm2 = vcmask 31744   ;;  %v1311_v43 = vmov 683565275  }
  0x4c   :  { %v1056_v11 = vpack.c.bf16 %v329_v10, %v328_v9  ;;  %v331_v13 = vld [vmem:[#allocation2 + $0x38] sm:$0xff]  ;;  %v332_v15 = vld [vmem:[#allocation2 + $0x40] sm:$0xff]  ;;  %v333_v16 = vld [vmem:[#allocation2 + $0x48] sm:$0xff]  ;;  %939 = vmatprep.subr.mxu1 %v1310_v20  ;;  %941 = vmatprep.mubr.msk.f32.mxu1 %vm1309_vm0, %v1310_v20  ;;  %v1312_v45 = vmov 2475754826   ;;  %s1317_s24 = smov [#allocation10]  }
  0x4d   :  { %1051 = vmatpush3.bf16.msra.mxu0 %v1050_v4  ;;  %v1059_v14 = vpack.c.bf16 %v331_v13, %v330_v12  ;;  %v334_v17 = vld [vmem:[#allocation2 + $0x50] sm:$0xff]  ;;  %v1062_v18 = vpack.c.bf16 %v333_v16, %v332_v15  ;;  %v335_v19 = vld [vmem:[#allocation2 + $0x58] sm:$0xff]  ;;  %v336_v22 = vld [vmem:[#allocation2 + $0x60] sm:$0xff]  ;;  %v1313_v48 = vmov 2131351028   ;;  %s805_s26 = sshll.u32 %s1317_s24, 4  ;;  %s806_s26 = int_to_ptr.vmem [resolvable:$true] %s805_s26 }
  0x4e   :  { %1052 = vmatprep.subr.bf16.mxu0 %v1308_v5  ;;  %v1065_v21 = vpack.c.bf16 %v335_v19, %v334_v17  ;;  %v337_v23 = vld [vmem:[#allocation2 + $0x68] sm:$0xff]  ;;  %v338_v25 = vld [vmem:[#allocation2 + $0x70] sm:$0xff]  ;;  %v339_v26 = vld [vmem:[#allocation2 + $0x78] sm:$0xff]  ;;  %v1314_v51 = vmov 2102212464   ;;  %p1276_p5 = scmp.lt.s32.totalorder %s806_s26, %s806_s26 }
  0x4f   :  { %v1068_v24 = vpack.c.bf16 %v337_v23, %v336_v22  ;;  %v1071_v27 = vpack.c.bf16 %v339_v26, %v338_v25  ;;  %v441_v28 = vld [vmem:[%s1564_s6] sm:$0xf]  ;;  %v1315_v54 = vmov 920167782   ;;  %v1316_v57 = vmov 1326507024  }
  0x50   :  { %v440_v29 = vld [vmem:[%s1559_s1] sm:$0xff]  ;;  %940 = vmatpush3.msk.msra.mxu1 %vm446_vm1, %v441_v28 }
  0x51   :  { %1054 = vmatpush3.bf16.msra.mxu0 %v1053_v8  ;;  %942 = vmatmul.mubr.msk.f32.vlgmr.msra.gmra.mrb[0].mxu1 %vm442_vm2, %v440_v29  ;;  %v816_v30 = vld [vmem:[%s1560_s2] ss:$0 sm:$0xff] }
  0x52   :  { %1055 = vmatprep.subr.bf16.mxu0 %v1308_v5  ;;  %1073 = vmatprep.subr.bf16.mxu1 %v1308_v5 }
  0x53   :  { %976 = vmatprep.mubr.msk.f32.mxu1 %vm1309_vm0, %v1310_v20 }
  0x55   :  { %1057 = vmatpush3.bf16.msra.mxu0 %v1056_v11 }
  0x56   :  { %1058 = vmatprep.subr.bf16.mxu0 %v1308_v5 }
  0x59   :  { %1060 = vmatpush3.bf16.msra.mxu0 %v1059_v14 }
  0x5a   :  { %1061 = vmatprep.subr.bf16.mxu0 %v1308_v5 }
  0x5d   :  { %1063 = vmatpush3.bf16.msra.mxu0 %v1062_v18 }
  0x5e   :  { %1064 = vmatprep.subr.bf16.mxu0 %v1308_v5 }
  0x61   :  { %1066 = vmatpush3.bf16.msra.mxu0 %v1065_v21 }
  0x62   :  { %1067 = vmatprep.subr.bf16.mxu0 %v1308_v5 }
  0x65   :  { %1069 = vmatpush3.bf16.msra.mxu0 %v1068_v24 }
  0x66   :  { %1070 = vmatprep.subr.bf16.mxu0 %v1308_v5 }
  0x69   :  { %1072 = vmatpush3.bf16.msra.mxu0 %v1071_v27 }
  0x6a   :  { %1097 = vmatprep.subr.bf16.mxu0 %v1308_v5 }
  0xca   :  { %v102_v31 = vpop.permute.xlu0 %101 }
  0xcb   :  { %v1486_v32 = vmul.f32 %v816_v30, %v102_v31 }
  0xcd   :  { %v117_v33 = vand.u32 2139095040, %v1486_v32  ;;  %v114_v37 = vand.u32 2147483647, %v1486_v32  ;;  %vm116_vm10 = vcmp.lt.s32.totalorder %v1486_v32, 0 }
  0xcf   :  { %v118_v34 = vshrl.u32 %v117_v33, 23  ;;  %v121_v40 = vand.u32 8388607, %v114_v37  ;;  %vm115_vm11 = vcmp.le.f32.partialorder %v114_v37, 0.7853982 }
  0xd1   :  { %v817_v35 = vadd.s32 4294967169, %v118_v34  ;;  %v122_v59 = vor.u32 8388608, %v121_v40 }
  0xd3   :  { %v124_v36 = vadd.s32 1, %v817_v35  ;;  %v162_v10 = vshll.u32 %v122_v59, 8 }
  0xd5   :  { %vm125_vm3 = vcmp.gt.s32.totalorder %v124_v36, 0 }
  0xd6   :  { %v126_v38 = vsel %vm125_vm3, %v124_v36, 0 }
  0xd7   :  { %v128_v39 = vand.u32 31, %v126_v38  ;;  %v127_v42 = vshrl.u32 %v126_v38, 5 }
  0xd9   :  { %v129_v41 = vsub.s32 32, %v128_v39  ;;  %v131_v44 = vshll.u32 %v1311_v43, %v128_v39  ;;  %v134_v46 = vshll.u32 %v1312_v45, %v128_v39  ;;  %v137_v50 = vshll.u32 %v1313_v48, %v128_v39 }
  0xda   :  { %v140_v53 = vshll.u32 %v1314_v51, %v128_v39  ;;  %v143_v56 = vshll.u32 %v1315_v54, %v128_v39  ;;  %vm146_vm4 = vcmp.lt.s32.totalorder %v127_v42, 1  ;;  %vm149_vm5 = vcmp.lt.s32.totalorder %v127_v42, 4 }
  0xdb   :  { %v132_v47 = vshrl.u32 %v1312_v45, %v129_v41  ;;  %v135_v49 = vshrl.u32 %v1313_v48, %v129_v41  ;;  %v138_v52 = vshrl.u32 %v1314_v51, %v129_v41  ;;  %v141_v55 = vshrl.u32 %v1315_v54, %v129_v41 }
  0xdc   :  { %v144_v58 = vshrl.u32 %v1316_v57, %v129_v41  ;;  %v130_v4 = vshrl.u32 %v1311_v43, %v129_v41  ;;  %vm148_vm6 = vcmp.lt.s32.totalorder %v127_v42, 3  ;;  %vm147_vm7 = vcmp.lt.s32.totalorder %v127_v42, 2 }
  0xdd   :  { %v133_v60 = vor.u32 %v132_v47, %v131_v44  ;;  %v136_v61 = vor.u32 %v135_v49, %v134_v46  ;;  %v139_v62 = vor.u32 %v138_v52, %v137_v50  ;;  %v142_v63 = vor.u32 %v141_v55, %v140_v53 }
  0xde   :  { %v145_v0 = vor.u32 %v144_v58, %v143_v56  ;;  %v111_v54 = vlaneseq }
  0xdf   :  { %v151_v1 = vsel %vm149_vm5, %v139_v62, 2102212464  ;;  %v154_v2 = vsel %vm146_vm4, %v133_v60, %v136_v61  ;;  %v158_v3 = vsel %vm146_vm4, %v136_v61, %v139_v62  ;;  %v155_v6 = vsel %vm149_vm5, %v142_v63, 920167782 }
  0xe0   :  { %v159_v7 = vsel %vm149_vm5, %v145_v0, 1326507024  ;;  %v156_v8 = vsel %vm148_vm6, %v139_v62, %v155_v6  ;;  %v150_v11 = vsel %vm146_vm4, %v130_v4, %v133_v60  ;;  %v152_v12 = vsel %vm148_vm6, %v136_v61, %v151_v1 }
  0xe1   :  { %v160_v9 = vsel %vm148_vm6, %v142_v63, %v159_v7  ;;  %v157_v13 = vsel %vm147_vm7, %v154_v2, %v156_v8  ;;  %v153_v19 = vsel %vm147_vm7, %v150_v11, %v152_v12  ;;  %v112_v56 = vand.u32 127, %v111_v54  ;;  %v424_v8 = vld [vmem:[#allocation5] sm:$0xff]  ;;  %v426_v11 = vld [vmem:[#allocation5 + $0x10] sm:$0xff]  ;;  %v427_v12 = vld [vmem:[#allocation5 + $0x18] sm:$0xff] }
  0xe2   :  { %v161_v14 = vsel %vm147_vm7, %v158_v3, %v160_v9  ;;  %v1495_v17 = vmul.u32.u64.low %v162_v10, %v157_v13  ;;  %v1496_v18 = vmul.u32.u64.high %v162_v10, %v157_v13, %v1495_v17  ;;  %v169_v22 = vmul.u32 %v162_v10, %v153_v19  ;;  %v425_v9 = vld [vmem:[#allocation5 + $0x8] sm:$0xff]  ;;  %v432_v19 = vld [vmem:[#allocation5 + $0x40] sm:$0xff]  ;;  %v611_v54 = vld [vmem:[#allocation7 + $0x30] sm:$0xff] }
  0xe3   :  { %v1492_v15 = vmul.u32.u64.low %v162_v10, %v161_v14  ;;  %v1493_v16 = vmul.u32.u64.high %v162_v10, %v161_v14, %v1492_v15  ;;  %vm113_vm12 = vcmp.lt.s32.totalorder %v112_v56, 64  ;;  %vm206_vm4 = vweird.f32 %v1486_v32  ;;  %v429_v14 = vld [vmem:[#allocation5 + $0x28] sm:$0xff]  ;;  %v613_v56 = vld [vmem:[#allocation7 + $0x40] sm:$0xff] }
  0xe4   :  { %v172_v21 = vadd.s32 1, %v1496_v18  ;;  %v1074_v10 = vpack.c.bf16 %v425_v9, %v424_v8  ;;  %v1077_v13 = vpack.c.bf16 %v427_v12, %v426_v11 }
  0xe5   :  { %vm171_vm8 = vc.u32 %v1493_v16, %v1495_v17  ;;  %v170_v35 = vadd.s32 %v1495_v17, %v1493_v16  ;;  %v430_v16 = vld [vmem:[#allocation5 + $0x30] sm:$0xff]  ;;  %v431_v17 = vld [vmem:[#allocation5 + $0x38] sm:$0xff] }
  0xe6   :  { %v173_v23 = vsel %vm171_vm8, %v172_v21, %v1496_v18  ;;  %1075 = vmatpush3.bf16.msra.mxu1 %v1074_v10  ;;  %v1083_v18 = vpack.c.bf16 %v431_v17, %v430_v16  ;;  %v433_v21 = vld [vmem:[#allocation5 + $0x48] sm:$0xff]  ;;  %v707_v16 = vld [vmem:[#allocation8 + $0x10] sm:$0xff]  ;;  %v708_v17 = vld [vmem:[#allocation8 + $0x18] sm:$0xff] }
  0xe7   :  { %v174_v24 = vadd.s32 %v173_v23, %v169_v22  ;;  %1076 = vmatprep.subr.bf16.mxu1 %v1308_v5  ;;  %v1086_v22 = vpack.c.bf16 %v433_v21, %v432_v19  ;;  %v434_v23 = vld [vmem:[#allocation5 + $0x50] sm:$0xff]  ;;  %v709_v19 = vld [vmem:[#allocation8 + $0x20] sm:$0xff]  ;;  %v710_v21 = vld [vmem:[#allocation8 + $0x28] sm:$0xff] }
  0xe9   :  { %v175_v25 = vadd.s32 536870912, %v174_v24 }
  0xea   :  { %1078 = vmatpush3.bf16.msra.mxu1 %v1077_v13 }
  0xeb   :  { %v176_v26 = vshrl.u32 %v175_v25, 30  ;;  %1079 = vmatprep.subr.bf16.mxu1 %v1308_v5 }
  0xed   :  { %v177_v27 = vshll.u32 %v176_v26, 30  ;;  %v200_v48 = vsub.s32 4, %v176_v26 }
  0xef   :  { %v178_v28 = vsub.s32 %v174_v24, %v177_v27  ;;  %v201_v51 = vsel %vm116_vm10, %v200_v48, %v176_v26  ;;  %v435_v24 = vld [vmem:[#allocation5 + $0x58] sm:$0xff]  ;;  %v436_v26 = vld [vmem:[#allocation5 + $0x60] sm:$0xff]  ;;  %v437_v27 = vld [vmem:[#allocation5 + $0x68] sm:$0xff] }
  0xf0   :  { %v203_v53 = vsel %vm115_vm11, 0, %v201_v51  ;;  %v1089_v25 = vpack.c.bf16 %v435_v24, %v434_v23  ;;  %v607_v48 = vld [vmem:[#allocation7 + $0x10] sm:$0xff]  ;;  %v609_v51 = vld [vmem:[#allocation7 + $0x20] sm:$0xff]  ;;  %v712_v24 = vld [vmem:[#allocation8 + $0x38] sm:$0xff] }
  0xf1   :  { %v180_v29 = vsub.s32 0, %v178_v28  ;;  %v311_v55 = vadd.s32 3, %v203_v53  ;;  %v207_v57 = vand.u32 3, %v203_v53  ;;  %v711_v23 = vld [vmem:[#allocation8 + $0x30] sm:$0xff] }
  0xf3   :  { %v818_v30 = vmin.u32 %v180_v29, %v178_v28  ;;  %v312_v58 = vand.u32 3, %v311_v55  ;;  %vm212_vm13 = vcmp.eq.s32.totalorder %v207_v57, 2  ;;  %vm209_vm15 = vcmp.eq.s32.totalorder %v207_v57, 0  ;;  %v438_v29 = vld [vmem:[#allocation5 + $0x70] sm:$0xff] }
  0xf4   :  { %vm208_vm2 = vcmp.lt.s32.totalorder %v207_v57, 2  ;;  %v614_v57 = vld [vmem:[#allocation7 + $0x48] sm:$0xff] }
  0xf5   :  { %v182_v31 = vclz %v818_v30  ;;  %vm317_vm14 = vcmp.eq.s32.totalorder %v312_v58, 2  ;;  %vm314_vm1 = vcmp.eq.s32.totalorder %v312_v58, 0  ;;  %vm313_vm3 = vcmp.lt.s32.totalorder %v312_v58, 2  ;;  %v439_v30 = vld [vmem:[#allocation5 + $0x78] sm:$0xff] }
  0xf6   :  { %v1110_v58 = vpack.c.bf16 %v614_v57, %v613_v56 }
  0xf7   :  { %v819_v33 = vadd.s32 4294967294, %v182_v31  ;;  %v1095_v31 = vpack.c.bf16 %v439_v30, %v438_v29  ;;  %v715_v29 = vld [vmem:[#allocation8 + $0x50] sm:$0xff]  ;;  %v716_v30 = vld [vmem:[#allocation8 + $0x58] sm:$0xff] }
  0xf9   :  { %vm820_vm9 = vcmp.lt.s32.totalorder %v819_v33, 0 }
  0xfa   :  { %v185_v34 = vsel %vm820_vm9, 0, %v819_v33 }
  0xfb   :  { %v186_v36 = vsub.s32 32, %v185_v34  ;;  %v190_v38 = vsub.s32 4294967266, %v185_v34  ;;  %v187_v39 = vshll.u32 %v178_v28, %v185_v34  ;;  %v1092_v28 = vpack.c.bf16 %v437_v27, %v436_v26  ;;  %v713_v26 = vld [vmem:[#allocation8 + $0x40] sm:$0xff]  ;;  %v714_v27 = vld [vmem:[#allocation8 + $0x48] sm:$0xff] }
  0xfd   :  { %v188_v40 = vshrl.u32 %v170_v35, %v186_v36  ;;  %v191_v41 = vadd.s32 127, %v190_v38  ;;  %v825_v35 = vld [vmem:[%s1562_s4] ss:$0 sm:$0xff] }
  0xff   :  { %v189_v42 = vor.u32 %v188_v40, %v187_v39  ;;  %v192_v43 = vshll.u32 %v191_v41, 23 }
 0x101   :  { %v193_v44 = vor.u32 4788187, %v192_v43  ;;  %v196_v46 = vcvt.s32.f32 %v189_v42 }
 0x103   :  { %v194_v45 = vand.u32 2147483647, %v193_v44 }
 0x105   :  { %v197_v47 = vmul.f32 %v196_v46, %v194_v45  ;;  %v605_v45 = vld [vmem:[#allocation7] sm:$0xff]  ;;  %v606_v46 = vld [vmem:[#allocation7 + $0x8] sm:$0xff] }
 0x107   :  { %v198_v49 = vxor.u32 2147483648, %v197_v47 }
 0x109   :  { %v199_v50 = vsel %vm116_vm10, %v198_v49, %v197_v47  ;;  %v1098_v47 = vpack.c.bf16 %v606_v46, %v605_v45  ;;  %v608_v49 = vld [vmem:[#allocation7 + $0x18] sm:$0xff] }
 0x10a   :  { %v202_v52 = vsel %vm115_vm11, %v1486_v32, %v199_v50  ;;  %v428_v32 = vld [vmem:[#allocation5 + $0x20] sm:$0xff]  ;;  %v1101_v50 = vpack.c.bf16 %v608_v49, %v607_v48 }
 0x10b   :  { %1167 = vcosq.f32 %v202_v52  ;;  %v1080_v15 = vpack.c.bf16 %v429_v14, %v428_v32  ;;  %v705_v32 = vld [vmem:[#allocation8] sm:$0xff]  ;;  %v706_v14 = vld [vmem:[#allocation8 + $0x8] sm:$0xff] }
 0x10c   :  { %1169 = vsinq.f32 %v202_v52  ;;  %v610_v52 = vld [vmem:[#allocation7 + $0x28] sm:$0xff] }
 0x10d   :  { %1081 = vmatpush3.bf16.msra.mxu1 %v1080_v15  ;;  %v1104_v53 = vpack.c.bf16 %v610_v52, %v609_v51  ;;  %v1122_v15 = vpack.c.bf16 %v706_v14, %v705_v32 }
 0x10e   :  { %1082 = vmatprep.subr.bf16.mxu1 %v1308_v5 }
 0x111   :  { %1084 = vmatpush3.bf16.msra.mxu1 %v1083_v18  ;;  %v1125_v18 = vpack.c.bf16 %v708_v17, %v707_v16 }
 0x112   :  { %1085 = vmatprep.subr.bf16.mxu1 %v1308_v5 }
 0x115   :  { %v1168_v59 = vpop.eup %1167  ;;  %1087 = vmatpush3.bf16.msra.mxu1 %v1086_v22  ;;  %v1128_v22 = vpack.c.bf16 %v710_v21, %v709_v19 }
 0x116   :  { %v1170_v60 = vpop.eup %1169  ;;  %v213_v61 = vxor.u32 2147483648, %v1168_v59  ;;  %1088 = vmatprep.subr.bf16.mxu1 %v1308_v5 }
 0x117   :  { %v210_v62 = vxor.u32 2147483648, %v1170_v60 }
 0x118   :  { %v214_v37 = vsel %vm212_vm13, %v213_v61, %v1170_v60  ;;  %v319_v63 = vsel %vm317_vm14, %v213_v61, %v1170_v60  ;;  %v616_v60 = vld [vmem:[#allocation7 + $0x58] sm:$0xff] }
 0x119   :  { %v211_v0 = vsel %vm209_vm15, %v1168_v59, %v210_v62  ;;  %v316_v1 = vsel %vm314_vm1, %v1168_v59, %v210_v62  ;;  %1090 = vmatpush3.bf16.msra.mxu1 %v1089_v25  ;;  %v615_v59 = vld [vmem:[#allocation7 + $0x50] sm:$0xff]  ;;  %v617_v62 = vld [vmem:[#allocation7 + $0x60] sm:$0xff]  ;;  %v1131_v25 = vpack.c.bf16 %v712_v24, %v711_v23 }
 0x11a   :  { %v215_v2 = vsel %vm208_vm2, %v211_v0, %v214_v37  ;;  %v320_v3 = vsel %vm313_vm3, %v316_v1, %v319_v63  ;;  %1091 = vmatprep.subr.bf16.mxu1 %v1308_v5  ;;  %v1113_v61 = vpack.c.bf16 %v616_v60, %v615_v59  ;;  %v618_v37 = vld [vmem:[#allocation7 + $0x68] sm:$0xff]  ;;  %v619_v0 = vld [vmem:[#allocation7 + $0x70] sm:$0xff]  ;;  %v620_v1 = vld [vmem:[#allocation7 + $0x78] sm:$0xff] }
 0x11b   :  { %v216_v4 = vsel %vm206_vm4, nan, %v215_v2  ;;  %v321_v6 = vsel %vm206_vm4, nan, %v320_v3  ;;  %v1116_v63 = vpack.c.bf16 %v618_v37, %v617_v62  ;;  %v1119_v2 = vpack.c.bf16 %v620_v1, %v619_v0 }
 0x11c   :  { %v323_v7 = vsel %vm113_vm12, %v216_v4, %v321_v6  ;;  %v829_v4 = vld [vmem:[%s1565_s7] ss:$0 sm:$0xff] }
 0x11d   :  { %937 = vmatmul.mubr.f32.vlgmr.msra.gmra.mrb[0].mxu0 %v323_v7  ;;  %1093 = vmatpush3.bf16.msra.mxu1 %v1092_v28  ;;  %v1134_v28 = vpack.c.bf16 %v714_v27, %v713_v26 }
 0x11e   :  { %1011 = vmatprep.mubr.msk.f32.mxu0 %vm1309_vm0, %v1310_v20  ;;  %1094 = vmatprep.subr.bf16.mxu1 %v1308_v5 }
 0x11f   :  { %1099 = vmatpush3.bf16.msra.mxu0 %v1098_v47 }
 0x120   :  { %1100 = vmatprep.subr.bf16.mxu0 %v1308_v5 }
 0x121   :  { %1096 = vmatpush3.bf16.msra.mxu1 %v1095_v31  ;;  %v1137_v31 = vpack.c.bf16 %v716_v30, %v715_v29 }
 0x122   :  { %1121 = vmatprep.subr.bf16.mxu1 %v1308_v5 }
 0x123   :  { %1102 = vmatpush3.bf16.msra.mxu0 %v1101_v50 }
 0x124   :  { %v516_v33 = vpop.f32.mrb[0].mxu1  ;;  %1103 = vmatprep.subr.bf16.mxu0 %v1308_v5 }
 0x125   :  { %v943_v34 = vpop.f32.mrb[1].mxu1 }
 0x126   :  { %v718_v34 = vld [vmem:[#allocation8 + $0x68] sm:$0xff] }
 0x127   :  { %1105 = vmatpush3.bf16.msra.mxu0 %v1104_v53 }
 0x128   :  { %1106 = vmatprep.subr.bf16.mxu0 %v1308_v5 }
 0x1f0   :  { %v413_v36 = vpop.f32.mrb[0].mxu0 }
 0x1f1   :  { %v414_v38 = vadd.f32 %v825_v35, %v413_v36  ;;  %v938_v39 = vpop.f32.mrb[1].mxu0  ;;  %v719_v36 = vld [vmem:[#allocation8 + $0x70] sm:$0xff] }
 0x1f3   :  { %v826_v40 = vmul.f32 -1.442695, %v414_v38 }
 0x1f5   :  { %1171 = vpow2.f32 %v826_v40  ;;  %v831_v40 = vld [vmem:[%s1567_s9] ss:$0 sm:$0xff]  ;;  %s1271_s9 = scalar_lea.vmem %s806_s26, 128 }
 0x1f6   :  { %p1272_p4 = scmp.ne.s32.totalorder %s806_s26, %s1271_s9  ;;  %p1277_p6 = scmp.lt.s32.totalorder %s1271_s9, %s1271_s9 }
 0x1f8   :  { %p1278_p7 = por %p1277_p6, %p1276_p5 }
 0x1fa   :  { %p1279_p8 = pnand %p1278_p7, %p1272_p4 }
 0x1ff   :  { %v1172_v41 = vpop.eup %1171 }
 0x200   :  { %v420_v42 = vadd.f32 1.0, %v1172_v41 }
 0x202   :  { %1173 = vrcp.f32 %v420_v42 }
 0x20c   :  { %v1174_v43 = vpop.eup %1173 }
 0x20d   :  { %v423_v44 = vmul.f32 %v1174_v43, %v414_v38  ;;  %v720_v38 = vld [vmem:[#allocation8 + $0x78] sm:$0xff] }
 0x20e   :  { %v1143_v39 = vpack.c.bf16 %v720_v38, %v719_v36 }
 0x20f   :  { %977 = vmatmul.mubr.f32.vlgmr.msra.gmra.mrb[2].mxu1 %v423_v44 }
 0x210   :  { %1046 = vmatprep.mubr.msk.f32.mxu1 %vm1309_vm0, %v1310_v20  ;;  %v612_v20 = vld [vmem:[#allocation7 + $0x38] sm:$0xff]  ;;  %1123 = vmatpush3.bf16.msra.mxu1 %v1122_v15 }
 0x211   :  { %v1107_v55 = vpack.c.bf16 %v612_v20, %v611_v54  ;;  %1124 = vmatprep.subr.bf16.mxu1 %v1308_v5 }
 0x213   :  { %1108 = vmatpush3.bf16.msra.mxu0 %v1107_v55 }
 0x214   :  { %1109 = vmatprep.subr.bf16.mxu0 %v1308_v5  ;;  %1126 = vmatpush3.bf16.msra.mxu1 %v1125_v18 }
 0x215   :  { %1127 = vmatprep.subr.bf16.mxu1 %v1308_v5 }
 0x217   :  { %1111 = vmatpush3.bf16.msra.mxu0 %v1110_v58 }
 0x218   :  { %1112 = vmatprep.subr.bf16.mxu0 %v1308_v5  ;;  %1129 = vmatpush3.bf16.msra.mxu1 %v1128_v22 }
 0x219   :  { %1130 = vmatprep.subr.bf16.mxu1 %v1308_v5 }
 0x21b   :  { %1114 = vmatpush3.bf16.msra.mxu0 %v1113_v61 }
 0x21c   :  { %1115 = vmatprep.subr.bf16.mxu0 %v1308_v5  ;;  %1132 = vmatpush3.bf16.msra.mxu1 %v1131_v25 }
 0x21d   :  { %1133 = vmatprep.subr.bf16.mxu1 %v1308_v5 }
 0x21f   :  { %1117 = vmatpush3.bf16.msra.mxu0 %v1116_v63 }
 0x220   :  { %1118 = vmatprep.subr.bf16.mxu0 %v1308_v5  ;;  %1135 = vmatpush3.bf16.msra.mxu1 %v1134_v28 }
 0x221   :  { %1136 = vmatprep.subr.bf16.mxu1 %v1308_v5 }
 0x223   :  { %1120 = vmatpush3.bf16.msra.mxu0 %v1119_v2 }
 0x224   :  { %1138 = vmatpush3.bf16.msra.mxu1 %v1137_v31 }
 0x225   :  { %1139 = vmatprep.subr.bf16.mxu1 %v1308_v5 }
 0x2e2   :  { %v586_v3 = vpop.f32.mrb[2].mxu1 }
 0x2e3   :  { %v587_v6 = vadd.f32 %v586_v3, %v516_v33  ;;  %v978_v7 = vpop.f32.mrb[3].mxu1  ;;  %v717_v33 = vld [vmem:[#allocation8 + $0x60] sm:$0xff] }
 0x2e4   :  { %v1140_v35 = vpack.c.bf16 %v718_v34, %v717_v33 }
 0x2e5   :  { %v597_v8 = vadd.f32 %v829_v4, %v587_v6 }
 0x2e6   :  { %1141 = vmatpush3.bf16.msra.mxu1 %v1140_v35 }
 0x2e7   :  { %v830_v9 = vmul.f32 -1.442695, %v597_v8  ;;  %1142 = vmatprep.subr.bf16.mxu1 %v1308_v5  ;;  %v833_v5 = vld [vmem:[%s1569_s11] ss:$0 sm:$0xff] }
 0x2e9   :  { %1175 = vpow2.f32 %v830_v9 }
 0x2ea   :  { %1144 = vmatpush3.bf16.msra.mxu1 %v1143_v39 }
 0x2f3   :  { %v1176_v10 = vpop.eup %1175 }
 0x2f4   :  { %v601_v11 = vadd.f32 1.0, %v1176_v10 }
 0x2f6   :  { %1177 = vrcp.f32 %v601_v11 }
 0x300   :  { %v1178_v12 = vpop.eup %1177 }
 0x301   :  { %v604_v13 = vmul.f32 %v1178_v12, %v597_v8 }
 0x303   :  { %1012 = vmatmul.mubr.f32.vlgmr.msra.gmra.mrb[2].mxu0 %v604_v13 }
 0x3d6   :  { %v694_v41 = vpop.f32.mrb[2].mxu0 }
 0x3d7   :  { %v695_v42 = vadd.f32 %v831_v40, %v694_v41  ;;  %v1013_v43 = vpop.f32.mrb[3].mxu0 }
 0x3d9   :  { %v832_v44 = vmul.f32 -1.442695, %v695_v42 }
 0x3db   :  { %1179 = vpow2.f32 %v832_v44 }
 0x3e5   :  { %v1180_v45 = vpop.eup %1179 }
 0x3e6   :  { %v701_v46 = vadd.f32 1.0, %v1180_v45 }
 0x3e8   :  { %1181 = vrcp.f32 %v701_v46 }
 0x3f2   :  { %v1182_v47 = vpop.eup %1181 }
 0x3f3   :  { %v704_v48 = vmul.f32 %v1182_v47, %v695_v42 }
 0x3f5   :  { %1047 = vmatmul.mubr.f32.vlgmr.msra.gmra.mrb[4].mxu1 %v704_v48 }
 0x4c8   :  { %v794_v49 = vpop.f32.mrb[4].mxu1 }
 0x4c9   :  { %v795_v50 = vadd.f32 %v833_v5, %v794_v49  ;;  %v1048_v51 = vpop.f32.mrb[5].mxu1 }
 0x4cb   :  { %798 = vst [vmem:[#allocation10] sm:$0xff] %v795_v50 }
 0x4cc   :  { %1282 = shalt.err (!%p1279_p8)
}
 0x4cd   :  { %s1283_s5 = scalar_lea.hbm %s1570_s12, 128 }
 0x4ce   :  { %p1284_p9 = scmp.ne.s32.totalorder %s1570_s12, %s1283_s5  ;;  %p1287_p10 = scmp.lt.u32.totalorder %s1283_s5, %s1570_s12 }
 0x4d0   :  { %p1289_p11 = pnand %p1287_p10, %p1284_p9 }
 0x4d2   :  { %1292 = shalt.err (!%p1289_p11)
}
 0x4d3   :  { %808 = dma.vmem_to_hbm [thread:$0]  %s806_s26, 128, %s1570_s12, [#allocation4]  }
 0x4d4   :  { %1299 = dma.done.wait [#allocation4], 128  }
 0x4d5   :  { %1300 = vsyncadd [#allocation4], 4294967168 }
 0x4d6   :  { %812 = vsyncpa [#allocation3], 1 }
 0x4d7   :  { %813 = vsyncpa [#allocation6], 1 }
 0x4d8   :  { %814 = vsyncpa [#allocation9], 1 }
 0x4d9   :  { %815 = vsyncpa [#allocation4], 1 }

// kernel: tpu_custom_call.1
= control target key start
LH: loop header
LB: loop body
LE: loop exit
PB: predicated region body
PF: predicated region fallthrough
CT: control target
= control target key end

     0   :  { %17 = vsyncpa [#allocation3], 0  ;;  %s1558_s0 = inlined_call_operand.vmem [shape: f32[8,1], index: 0, kind: input, shape index: {}]   ;;  %s1559_s1 = inlined_call_operand.vmem [shape: f32[8,4], index: 1, kind: input, shape index: {}]   ;;  %s1560_s2 = inlined_call_operand.vmem [shape: f32[1,128], index: 2, kind: input, shape index: {}]   ;;  %s1561_s3 = inlined_call_operand.hbm [shape: f32[128,128], index: 3, kind: input, shape index: {}]   ;;  %s1562_s4 = inlined_call_operand.vmem [shape: f32[1,128], index: 4, kind: input, shape index: {}]   ;;  %s1563_s5 = inlined_call_operand.hbm [shape: f32[128,128], index: 5, kind: input, shape index: {}]   ;;  %s1564_s6 = inlined_call_operand.vmem [shape: f32[4,128], index: 6, kind: input, shape index: {}]   ;;  %s1565_s7 = inlined_call_operand.vmem [shape: f32[1,128], index: 7, kind: input, shape index: {}]   ;;  %s1566_s8 = inlined_call_operand.hbm [shape: f32[128,128], index: 8, kind: input, shape index: {}]   ;;  %s1567_s9 = inlined_call_operand.vmem [shape: f32[1,128], index: 9, kind: input, shape index: {}]   ;;  %s1568_s10 = inlined_call_operand.hbm [shape: f32[128,128], index: 10, kind: input, shape index: {}]   ;;  %s1569_s11 = inlined_call_operand.vmem [shape: f32[1,128], index: 11, kind: input, shape index: {}]   ;;  %s1570_s12 = inlined_call_operand.hbm [shape: f32[8,128], index: 12, kind: output, shape index: {}]  }
   0x1   :  { %18 = vsyncpa [#allocation6], 0 }
   0x2   :  { %19 = vsyncpa [#allocation9], 0 }
   0x3   :  { %20 = vsyncpa [#allocation4], 0  ;;  %s1301_s21 = smov [#allocation5]   ;;  %s1302_s23 = smov [#allocation2]  }
   0x4   :  { %s46_s22 = sshll.u32 %s1301_s21, 4  ;;  %s32_s24 = sshll.u32 %s1302_s23, 4  ;;  %s47_s22 = int_to_ptr.vmem [resolvable:$true] %s46_s22  ;;  %s1383_s24 = int_to_ptr.vmem [resolvable:$true] %s32_s24 }
   0x5   :  { %s1183_s27 = scalar_lea.hbm %s1563_s5, 2048 }
   0x6   :  { %p1184_p0 = scmp.ne.s32.totalorder %s1563_s5, %s1183_s27  ;;  %p1187_p1 = scmp.lt.u32.totalorder %s1183_s27, %s1563_s5 }
   0x8   :  { %p1189_p2 = pnand %p1187_p1, %p1184_p0 }
   0xa   :  { %1192 = shalt.err (!%p1189_p2)
}
   0xb   :  { %s1193_s14 = scalar_lea.vmem %s47_s22, 2048  ;;  %p1198_p4 = scmp.lt.s32.totalorder %s47_s22, %s47_s22 }
   0xc   :  { %p1194_p3 = scmp.ne.s32.totalorder %s47_s22, %s1193_s14  ;;  %p1199_p5 = scmp.lt.s32.totalorder %s1193_s14, %s1193_s14 }
   0xe   :  { %p1200_p6 = por %p1199_p5, %p1198_p4 }
  0x10   :  { %p1201_p7 = pnand %p1200_p6, %p1194_p3 }
  0x12   :  { %1204 = shalt.err (!%p1201_p7)
}
  0x13   :  { %s1303_s15 = smov 128   ;;  %s1304_s16 = smov 8  }
  0x14   :  { %52 = dma.hbm_to_vmem [thread:$0]  %s1563_s5, 2048, %s47_s22, [#allocation6], %s1303_s15, %s1303_s15, %s1304_s16  }
  0x15   :  { %s1205_s21 = scalar_lea.hbm %s1561_s3, 2048 }
  0x16   :  { %p1206_p8 = scmp.ne.s32.totalorder %s1561_s3, %s1205_s21  ;;  %p1209_p9 = scmp.lt.u32.totalorder %s1205_s21, %s1561_s3 }
  0x18   :  { %p1211_p10 = pnand %p1209_p9, %p1206_p8 }
  0x1a   :  { %1214 = shalt.err (!%p1211_p10)
}
  0x1b   :  { %s1215_s28 = scalar_lea.vmem %s1383_s24, 2048  ;;  %p1220_p12 = scmp.lt.s32.totalorder %s1383_s24, %s1383_s24 }
  0x1c   :  { %p1216_p11 = scmp.ne.s32.totalorder %s1383_s24, %s1215_s28  ;;  %p1221_p13 = scmp.lt.s32.totalorder %s1215_s28, %s1215_s28 }
  0x1e   :  { %p1222_p0 = por %p1221_p13, %p1220_p12 }
  0x20   :  { %p1223_p1 = pnand %p1222_p0, %p1216_p11 }
  0x22   :  { %1226 = shalt.err (!%p1223_p1)
}
  0x23   :  { %38 = dma.hbm_to_vmem [thread:$0]  %s1561_s3, 2048, %s1383_s24, [#allocation3], %s1303_s15, %s1303_s15, %s1304_s16  }
  0x24   :  { %s1305_s29 = smov [#allocation7]   ;;  %s1306_s13 = smov [#allocation8]  }
  0x25   :  { %s62_s30 = sshll.u32 %s1305_s29, 4  ;;  %s76_s14 = sshll.u32 %s1306_s13, 4  ;;  %s63_s30 = int_to_ptr.vmem [resolvable:$true] %s62_s30  ;;  %s1420_s14 = int_to_ptr.vmem [resolvable:$true] %s76_s14 }
  0x26   :  { %s1227_s19 = scalar_lea.hbm %s1566_s8, 2048 }
  0x27   :  { %p1228_p2 = scmp.ne.s32.totalorder %s1566_s8, %s1227_s19  ;;  %p1231_p3 = scmp.lt.u32.totalorder %s1227_s19, %s1566_s8 }
  0x29   :  { %p1233_p4 = pnand %p1231_p3, %p1228_p2 }
  0x2b   :  { %1236 = shalt.err (!%p1233_p4)
}
  0x2c   :  { %s1237_s3 = scalar_lea.vmem %s63_s30, 2048  ;;  %p1242_p6 = scmp.lt.s32.totalorder %s63_s30, %s63_s30 }
  0x2d   :  { %p1238_p5 = scmp.ne.s32.totalorder %s63_s30, %s1237_s3  ;;  %p1243_p7 = scmp.lt.s32.totalorder %s1237_s3, %s1237_s3 }
  0x2f   :  { %p1244_p8 = por %p1243_p7, %p1242_p6 }
  0x31   :  { %p1245_p9 = pnand %p1244_p8, %p1238_p5 }
  0x33   :  { %1248 = shalt.err (!%p1245_p9)
}
  0x34   :  { %68 = dma.hbm_to_vmem [thread:$0]  %s1566_s8, 2048, %s63_s30, [#allocation6], %s1303_s15, %s1303_s15, %s1304_s16  }
  0x35   :  { %s1249_s5 = scalar_lea.hbm %s1568_s10, 2048 }
  0x36   :  { %p1250_p10 = scmp.ne.s32.totalorder %s1568_s10, %s1249_s5  ;;  %p1253_p11 = scmp.lt.u32.totalorder %s1249_s5, %s1568_s10 }
  0x38   :  { %p1255_p12 = pnand %p1253_p11, %p1250_p10 }
  0x3a   :  { %1258 = shalt.err (!%p1255_p12)
}
  0x3b   :  { %s1259_s18 = scalar_lea.vmem %s1420_s14, 2048  ;;  %p1264_p0 = scmp.lt.s32.totalorder %s1420_s14, %s1420_s14 }
  0x3c   :  { %p1260_p13 = scmp.ne.s32.totalorder %s1420_s14, %s1259_s18  ;;  %p1265_p1 = scmp.lt.s32.totalorder %s1259_s18, %s1259_s18 }
  0x3e   :  { %p1266_p2 = por %p1265_p1, %p1264_p0 }
  0x40   :  { %p1267_p3 = pnand %p1266_p2, %p1260_p13 }
  0x42   :  { %1270 = shalt.err (!%p1267_p3)
}
  0x43   :  { %82 = dma.hbm_to_vmem [thread:$0]  %s1568_s10, 2048, %s1420_s14, [#allocation9], %s1303_s15, %s1303_s15, %s1304_s16  }
  0x44   :  { %1293 = dma.done.wait [#allocation3], 2048  }
  0x45   :  { %1294 = vsyncadd [#allocation3], 4294965248 }
  0x46   :  { %1295 = dma.done.wait [#allocation6], 4096  }
  0x47   :  { %1296 = vsyncadd [#allocation6], 4294963200 }
  0x48   :  { %1297 = dma.done.wait [#allocation9], 2048  }
  0x49   :  { %1298 = vsyncadd [#allocation9], 4294965248  ;;  %v1307_v0 = vmov 0   ;;  %v97_v1 = vld [vmem:[%s1558_s0] sm:$0xff]  ;;  %v324_v2 = vld [vmem:[#allocation2] sm:$0xff]  ;;  %v1308_v5 = vmov 0.0|0.0  }
  0x4a   :  { %1166 = vset.pattern.permute.xlu0 %v1307_v0  ;;  %v325_v3 = vld [vmem:[#allocation2 + $0x8] sm:$0xff]  ;;  %1049 = vmatprep.subr.bf16.mxu0 %v1308_v5  ;;  %v326_v6 = vld [vmem:[#allocation2 + $0x10] sm:$0xff]  ;;  %v327_v7 = vld [vmem:[#allocation2 + $0x18] sm:$0xff]  ;;  %vm1309_vm0 = vmmov 0   ;;  %v1310_v20 = vmov 0.0   ;;  %vm446_vm1 = vcmask 1043456  }
  0x4b   :  { %101 = vperm.xlu0 %1166, %v97_v1   ;;  %v1050_v4 = vpack.c.bf16 %v325_v3, %v324_v2  ;;  %v1053_v8 = vpack.c.bf16 %v327_v7, %v326_v6  ;;  %v328_v9 = vld [vmem:[#allocation2 + $0x20] sm:$0xff]  ;;  %v329_v10 = vld [vmem:[#allocation2 + $0x28] sm:$0xff]  ;;  %v330_v12 = vld [vmem:[#allocation2 + $0x30] sm:$0xff]  ;;  %936 = vmatprep.mubr.msk.f32.mxu0 %vm1309_vm0, %v1310_v20  ;;  %vm442_vm2 = vcmask 31744   ;;  %v1311_v43 = vmov 683565275  }
  0x4c   :  { %v1056_v11 = vpack.c.bf16 %v329_v10, %v328_v9  ;;  %v331_v13 = vld [vmem:[#allocation2 + $0x38] sm:$0xff]  ;;  %v332_v15 = vld [vmem:[#allocation2 + $0x40] sm:$0xff]  ;;  %v333_v16 = vld [vmem:[#allocation2 + $0x48] sm:$0xff]  ;;  %939 = vmatprep.subr.mxu1 %v1310_v20  ;;  %941 = vmatprep.mubr.msk.f32.mxu1 %vm1309_vm0, %v1310_v20  ;;  %v1312_v45 = vmov 2475754826   ;;  %s1317_s24 = smov [#allocation10]  }
  0x4d   :  { %1051 = vmatpush3.bf16.msra.mxu0 %v1050_v4  ;;  %v1059_v14 = vpack.c.bf16 %v331_v13, %v330_v12  ;;  %v334_v17 = vld [vmem:[#allocation2 + $0x50] sm:$0xff]  ;;  %v1062_v18 = vpack.c.bf16 %v333_v16, %v332_v15  ;;  %v335_v19 = vld [vmem:[#allocation2 + $0x58] sm:$0xff]  ;;  %v336_v22 = vld [vmem:[#allocation2 + $0x60] sm:$0xff]  ;;  %v1313_v48 = vmov 2131351028   ;;  %s805_s26 = sshll.u32 %s1317_s24, 4  ;;  %s806_s26 = int_to_ptr.vmem [resolvable:$true] %s805_s26 }
  0x4e   :  { %1052 = vmatprep.subr.bf16.mxu0 %v1308_v5  ;;  %v1065_v21 = vpack.c.bf16 %v335_v19, %v334_v17  ;;  %v337_v23 = vld [vmem:[#allocation2 + $0x68] sm:$0xff]  ;;  %v338_v25 = vld [vmem:[#allocation2 + $0x70] sm:$0xff]  ;;  %v339_v26 = vld [vmem:[#allocation2 + $0x78] sm:$0xff]  ;;  %v1314_v51 = vmov 2102212464   ;;  %p1276_p5 = scmp.lt.s32.totalorder %s806_s26, %s806_s26 }
  0x4f   :  { %v1068_v24 = vpack.c.bf16 %v337_v23, %v336_v22  ;;  %v1071_v27 = vpack.c.bf16 %v339_v26, %v338_v25  ;;  %v441_v28 = vld [vmem:[%s1564_s6] sm:$0xf]  ;;  %v1315_v54 = vmov 920167782   ;;  %v1316_v57 = vmov 1326507024  }
  0x50   :  { %v440_v29 = vld [vmem:[%s1559_s1] sm:$0xff]  ;;  %940 = vmatpush3.msk.msra.mxu1 %vm446_vm1, %v441_v28 }
  0x51   :  { %1054 = vmatpush3.bf16.msra.mxu0 %v1053_v8  ;;  %942 = vmatmul.mubr.msk.f32.vlgmr.msra.gmra.mrb[0].mxu1 %vm442_vm2, %v440_v29  ;;  %v816_v30 = vld [vmem:[%s1560_s2] ss:$0 sm:$0xff] }
  0x52   :  { %1055 = vmatprep.subr.bf16.mxu0 %v1308_v5  ;;  %1073 = vmatprep.subr.bf16.mxu1 %v1308_v5 }
  0x53   :  { %976 = vmatprep.mubr.msk.f32.mxu1 %vm1309_vm0, %v1310_v20 }
  0x55   :  { %1057 = vmatpush3.bf16.msra.mxu0 %v1056_v11 }
  0x56   :  { %1058 = vmatprep.subr.bf16.mxu0 %v1308_v5 }
  0x59   :  { %1060 = vmatpush3.bf16.msra.mxu0 %v1059_v14 }
  0x5a   :  { %1061 = vmatprep.subr.bf16.mxu0 %v1308_v5 }
  0x5d   :  { %1063 = vmatpush3.bf16.msra.mxu0 %v1062_v18 }
  0x5e   :  { %1064 = vmatprep.subr.bf16.mxu0 %v1308_v5 }
  0x61   :  { %1066 = vmatpush3.bf16.msra.mxu0 %v1065_v21 }
  0x62   :  { %1067 = vmatprep.subr.bf16.mxu0 %v1308_v5 }
  0x65   :  { %1069 = vmatpush3.bf16.msra.mxu0 %v1068_v24 }
  0x66   :  { %1070 = vmatprep.subr.bf16.mxu0 %v1308_v5 }
  0x69   :  { %1072 = vmatpush3.bf16.msra.mxu0 %v1071_v27 }
  0x6a   :  { %1097 = vmatprep.subr.bf16.mxu0 %v1308_v5 }
  0xca   :  { %v102_v31 = vpop.permute.xlu0 %101 }
  0xcb   :  { %v1486_v32 = vmul.f32 %v816_v30, %v102_v31 }
  0xcd   :  { %v117_v33 = vand.u32 2139095040, %v1486_v32  ;;  %v114_v37 = vand.u32 2147483647, %v1486_v32  ;;  %vm116_vm10 = vcmp.lt.s32.totalorder %v1486_v32, 0 }
  0xcf   :  { %v118_v34 = vshrl.u32 %v117_v33, 23  ;;  %v121_v40 = vand.u32 8388607, %v114_v37  ;;  %vm115_vm11 = vcmp.le.f32.partialorder %v114_v37, 0.7853982 }
  0xd1   :  { %v817_v35 = vadd.s32 4294967169, %v118_v34  ;;  %v122_v59 = vor.u32 8388608, %v121_v40 }
  0xd3   :  { %v124_v36 = vadd.s32 1, %v817_v35  ;;  %v162_v10 = vshll.u32 %v122_v59, 8 }
  0xd5   :  { %vm125_vm3 = vcmp.gt.s32.totalorder %v124_v36, 0 }
  0xd6   :  { %v126_v38 = vsel %vm125_vm3, %v124_v36, 0 }
  0xd7   :  { %v128_v39 = vand.u32 31, %v126_v38  ;;  %v127_v42 = vshrl.u32 %v126_v38, 5 }
  0xd9   :  { %v129_v41 = vsub.s32 32, %v128_v39  ;;  %v131_v44 = vshll.u32 %v1311_v43, %v128_v39  ;;  %v134_v46 = vshll.u32 %v1312_v45, %v128_v39  ;;  %v137_v50 = vshll.u32 %v1313_v48, %v128_v39 }
  0xda   :  { %v140_v53 = vshll.u32 %v1314_v51, %v128_v39  ;;  %v143_v56 = vshll.u32 %v1315_v54, %v128_v39  ;;  %vm146_vm4 = vcmp.lt.s32.totalorder %v127_v42, 1  ;;  %vm149_vm5 = vcmp.lt.s32.totalorder %v127_v42, 4 }
  0xdb   :  { %v132_v47 = vshrl.u32 %v1312_v45, %v129_v41  ;;  %v135_v49 = vshrl.u32 %v1313_v48, %v129_v41  ;;  %v138_v52 = vshrl.u32 %v1314_v51, %v129_v41  ;;  %v141_v55 = vshrl.u32 %v1315_v54, %v129_v41 }
  0xdc   :  { %v144_v58 = vshrl.u32 %v1316_v57, %v129_v41  ;;  %v130_v4 = vshrl.u32 %v1311_v43, %v129_v41  ;;  %vm148_vm6 = vcmp.lt.s32.totalorder %v127_v42, 3  ;;  %vm147_vm7 = vcmp.lt.s32.totalorder %v127_v42, 2 }
  0xdd   :  { %v133_v60 = vor.u32 %v132_v47, %v131_v44  ;;  %v136_v61 = vor.u32 %v135_v49, %v134_v46  ;;  %v139_v62 = vor.u32 %v138_v52, %v137_v50  ;;  %v142_v63 = vor.u32 %v141_v55, %v140_v53 }
  0xde   :  { %v145_v0 = vor.u32 %v144_v58, %v143_v56  ;;  %v111_v54 = vlaneseq }
  0xdf   :  { %v151_v1 = vsel %vm149_vm5, %v139_v62, 2102212464  ;;  %v154_v2 = vsel %vm146_vm4, %v133_v60, %v136_v61  ;;  %v158_v3 = vsel %vm146_vm4, %v136_v61, %v139_v62  ;;  %v155_v6 = vsel %vm149_vm5, %v142_v63, 920167782 }
  0xe0   :  { %v159_v7 = vsel %vm149_vm5, %v145_v0, 1326507024  ;;  %v156_v8 = vsel %vm148_vm6, %v139_v62, %v155_v6  ;;  %v150_v11 = vsel %vm146_vm4, %v130_v4, %v133_v60  ;;  %v152_v12 = vsel %vm148_vm6, %v136_v61, %v151_v1 }
  0xe1   :  { %v160_v9 = vsel %vm148_vm6, %v142_v63, %v159_v7  ;;  %v157_v13 = vsel %vm147_vm7, %v154_v2, %v156_v8  ;;  %v153_v19 = vsel %vm147_vm7, %v150_v11, %v152_v12  ;;  %v112_v56 = vand.u32 127, %v111_v54  ;;  %v424_v8 = vld [vmem:[#allocation5] sm:$0xff]  ;;  %v426_v11 = vld [vmem:[#allocation5 + $0x10] sm:$0xff]  ;;  %v427_v12 = vld [vmem:[#allocation5 + $0x18] sm:$0xff] }
  0xe2   :  { %v161_v14 = vsel %vm147_vm7, %v158_v3, %v160_v9  ;;  %v1495_v17 = vmul.u32.u64.low %v162_v10, %v157_v13  ;;  %v1496_v18 = vmul.u32.u64.high %v162_v10, %v157_v13, %v1495_v17  ;;  %v169_v22 = vmul.u32 %v162_v10, %v153_v19  ;;  %v425_v9 = vld [vmem:[#allocation5 + $0x8] sm:$0xff]  ;;  %v432_v19 = vld [vmem:[#allocation5 + $0x40] sm:$0xff]  ;;  %v611_v54 = vld [vmem:[#allocation7 + $0x30] sm:$0xff] }
  0xe3   :  { %v1492_v15 = vmul.u32.u64.low %v162_v10, %v161_v14  ;;  %v1493_v16 = vmul.u32.u64.high %v162_v10, %v161_v14, %v1492_v15  ;;  %vm113_vm12 = vcmp.lt.s32.totalorder %v112_v56, 64  ;;  %vm206_vm4 = vweird.f32 %v1486_v32  ;;  %v429_v14 = vld [vmem:[#allocation5 + $0x28] sm:$0xff]  ;;  %v613_v56 = vld [vmem:[#allocation7 + $0x40] sm:$0xff] }
  0xe4   :  { %v172_v21 = vadd.s32 1, %v1496_v18  ;;  %v1074_v10 = vpack.c.bf16 %v425_v9, %v424_v8  ;;  %v1077_v13 = vpack.c.bf16 %v427_v12, %v426_v11 }
  0xe5   :  { %vm171_vm8 = vc.u32 %v1493_v16, %v1495_v17  ;;  %v170_v35 = vadd.s32 %v1495_v17, %v1493_v16  ;;  %v430_v16 = vld [vmem:[#allocation5 + $0x30] sm:$0xff]  ;;  %v431_v17 = vld [vmem:[#allocation5 + $0x38] sm:$0xff] }
  0xe6   :  { %v173_v23 = vsel %vm171_vm8, %v172_v21, %v1496_v18  ;;  %1075 = vmatpush3.bf16.msra.mxu1 %v1074_v10  ;;  %v1083_v18 = vpack.c.bf16 %v431_v17, %v430_v16  ;;  %v433_v21 = vld [vmem:[#allocation5 + $0x48] sm:$0xff]  ;;  %v707_v16 = vld [vmem:[#allocation8 + $0x10] sm:$0xff]  ;;  %v708_v17 = vld [vmem:[#allocation8 + $0x18] sm:$0xff] }
  0xe7   :  { %v174_v24 = vadd.s32 %v173_v23, %v169_v22  ;;  %1076 = vmatprep.subr.bf16.mxu1 %v1308_v5  ;;  %v1086_v22 = vpack.c.bf16 %v433_v21, %v432_v19  ;;  %v434_v23 = vld [vmem:[#allocation5 + $0x50] sm:$0xff]  ;;  %v709_v19 = vld [vmem:[#allocation8 + $0x20] sm:$0xff]  ;;  %v710_v21 = vld [vmem:[#allocation8 + $0x28] sm:$0xff] }
  0xe9   :  { %v175_v25 = vadd.s32 536870912, %v174_v24 }
  0xea   :  { %1078 = vmatpush3.bf16.msra.mxu1 %v1077_v13 }
  0xeb   :  { %v176_v26 = vshrl.u32 %v175_v25, 30  ;;  %1079 = vmatprep.subr.bf16.mxu1 %v1308_v5 }
  0xed   :  { %v177_v27 = vshll.u32 %v176_v26, 30  ;;  %v200_v48 = vsub.s32 4, %v176_v26 }
  0xef   :  { %v178_v28 = vsub.s32 %v174_v24, %v177_v27  ;;  %v201_v51 = vsel %vm116_vm10, %v200_v48, %v176_v26  ;;  %v435_v24 = vld [vmem:[#allocation5 + $0x58] sm:$0xff]  ;;  %v436_v26 = vld [vmem:[#allocation5 + $0x60] sm:$0xff]  ;;  %v437_v27 = vld [vmem:[#allocation5 + $0x68] sm:$0xff] }
  0xf0   :  { %v203_v53 = vsel %vm115_vm11, 0, %v201_v51  ;;  %v1089_v25 = vpack.c.bf16 %v435_v24, %v434_v23  ;;  %v607_v48 = vld [vmem:[#allocation7 + $0x10] sm:$0xff]  ;;  %v609_v51 = vld [vmem:[#allocation7 + $0x20] sm:$0xff]  ;;  %v712_v24 = vld [vmem:[#allocation8 + $0x38] sm:$0xff] }
  0xf1   :  { %v180_v29 = vsub.s32 0, %v178_v28  ;;  %v311_v55 = vadd.s32 3, %v203_v53  ;;  %v207_v57 = vand.u32 3, %v203_v53  ;;  %v711_v23 = vld [vmem:[#allocation8 + $0x30] sm:$0xff] }
  0xf3   :  { %v818_v30 = vmin.u32 %v180_v29, %v178_v28  ;;  %v312_v58 = vand.u32 3, %v311_v55  ;;  %vm212_vm13 = vcmp.eq.s32.totalorder %v207_v57, 2  ;;  %vm209_vm15 = vcmp.eq.s32.totalorder %v207_v57, 0  ;;  %v438_v29 = vld [vmem:[#allocation5 + $0x70] sm:$0xff] }
  0xf4   :  { %vm208_vm2 = vcmp.lt.s32.totalorder %v207_v57, 2  ;;  %v614_v57 = vld [vmem:[#allocation7 + $0x48] sm:$0xff] }
  0xf5   :  { %v182_v31 = vclz %v818_v30  ;;  %vm317_vm14 = vcmp.eq.s32.totalorder %v312_v58, 2  ;;  %vm314_vm1 = vcmp.eq.s32.totalorder %v312_v58, 0  ;;  %vm313_vm3 = vcmp.lt.s32.totalorder %v312_v58, 2  ;;  %v439_v30 = vld [vmem:[#allocation5 + $0x78] sm:$0xff] }
  0xf6   :  { %v1110_v58 = vpack.c.bf16 %v614_v57, %v613_v56 }
  0xf7   :  { %v819_v33 = vadd.s32 4294967294, %v182_v31  ;;  %v1095_v31 = vpack.c.bf16 %v439_v30, %v438_v29  ;;  %v715_v29 = vld [vmem:[#allocation8 + $0x50] sm:$0xff]  ;;  %v716_v30 = vld [vmem:[#allocation8 + $0x58] sm:$0xff] }
  0xf9   :  { %vm820_vm9 = vcmp.lt.s32.totalorder %v819_v33, 0 }
  0xfa   :  { %v185_v34 = vsel %vm820_vm9, 0, %v819_v33 }
  0xfb   :  { %v186_v36 = vsub.s32 32, %v185_v34  ;;  %v190_v38 = vsub.s32 4294967266, %v185_v34  ;;  %v187_v39 = vshll.u32 %v178_v28, %v185_v34  ;;  %v1092_v28 = vpack.c.bf16 %v437_v27, %v436_v26  ;;  %v713_v26 = vld [vmem:[#allocation8 + $0x40] sm:$0xff]  ;;  %v714_v27 = vld [vmem:[#allocation8 + $0x48] sm:$0xff] }
  0xfd   :  { %v188_v40 = vshrl.u32 %v170_v35, %v186_v36  ;;  %v191_v41 = vadd.s32 127, %v190_v38  ;;  %v825_v35 = vld [vmem:[%s1562_s4] ss:$0 sm:$0xff] }
  0xff   :  { %v189_v42 = vor.u32 %v188_v40, %v187_v39  ;;  %v192_v43 = vshll.u32 %v191_v41, 23 }
 0x101   :  { %v193_v44 = vor.u32 4788187, %v192_v43  ;;  %v196_v46 = vcvt.s32.f32 %v189_v42 }
 0x103   :  { %v194_v45 = vand.u32 2147483647, %v193_v44 }
 0x105   :  { %v197_v47 = vmul.f32 %v196_v46, %v194_v45  ;;  %v605_v45 = vld [vmem:[#allocation7] sm:$0xff]  ;;  %v606_v46 = vld [vmem:[#allocation7 + $0x8] sm:$0xff] }
 0x107   :  { %v198_v49 = vxor.u32 2147483648, %v197_v47 }
 0x109   :  { %v199_v50 = vsel %vm116_vm10, %v198_v49, %v197_v47  ;;  %v1098_v47 = vpack.c.bf16 %v606_v46, %v605_v45  ;;  %v608_v49 = vld [vmem:[#allocation7 + $0x18] sm:$0xff] }
 0x10a   :  { %v202_v52 = vsel %vm115_vm11, %v1486_v32, %v199_v50  ;;  %v428_v32 = vld [vmem:[#allocation5 + $0x20] sm:$0xff]  ;;  %v1101_v50 = vpack.c.bf16 %v608_v49, %v607_v48 }
 0x10b   :  { %1167 = vcosq.f32 %v202_v52  ;;  %v1080_v15 = vpack.c.bf16 %v429_v14, %v428_v32  ;;  %v705_v32 = vld [vmem:[#allocation8] sm:$0xff]  ;;  %v706_v14 = vld [vmem:[#allocation8 + $0x8] sm:$0xff] }
 0x10c   :  { %1169 = vsinq.f32 %v202_v52  ;;  %v610_v52 = vld [vmem:[#allocation7 + $0x28] sm:$0xff] }
 0x10d   :  { %1081 = vmatpush3.bf16.msra.mxu1 %v1080_v15  ;;  %v1104_v53 = vpack.c.bf16 %v610_v52, %v609_v51  ;;  %v1122_v15 = vpack.c.bf16 %v706_v14, %v705_v32 }
 0x10e   :  { %1082 = vmatprep.subr.bf16.mxu1 %v1308_v5 }
 0x111   :  { %1084 = vmatpush3.bf16.msra.mxu1 %v1083_v18  ;;  %v1125_v18 = vpack.c.bf16 %v708_v17, %v707_v16 }
 0x112   :  { %1085 = vmatprep.subr.bf16.mxu1 %v1308_v5 }
 0x115   :  { %v1168_v59 = vpop.eup %1167  ;;  %1087 = vmatpush3.bf16.msra.mxu1 %v1086_v22  ;;  %v1128_v22 = vpack.c.bf16 %v710_v21, %v709_v19 }
 0x116   :  { %v1170_v60 = vpop.eup %1169  ;;  %v213_v61 = vxor.u32 2147483648, %v1168_v59  ;;  %1088 = vmatprep.subr.bf16.mxu1 %v1308_v5 }
 0x117   :  { %v210_v62 = vxor.u32 2147483648, %v1170_v60 }
 0x118   :  { %v214_v37 = vsel %vm212_vm13, %v213_v61, %v1170_v60  ;;  %v319_v63 = vsel %vm317_vm14, %v213_v61, %v1170_v60  ;;  %v616_v60 = vld [vmem:[#allocation7 + $0x58] sm:$0xff] }
 0x119   :  { %v211_v0 = vsel %vm209_vm15, %v1168_v59, %v210_v62  ;;  %v316_v1 = vsel %vm314_vm1, %v1168_v59, %v210_v62  ;;  %1090 = vmatpush3.bf16.msra.mxu1 %v1089_v25  ;;  %v615_v59 = vld [vmem:[#allocation7 + $0x50] sm:$0xff]  ;;  %v617_v62 = vld [vmem:[#allocation7 + $0x60] sm:$0xff]  ;;  %v1131_v25 = vpack.c.bf16 %v712_v24, %v711_v23 }
 0x11a   :  { %v215_v2 = vsel %vm208_vm2, %v211_v0, %v214_v37  ;;  %v320_v3 = vsel %vm313_vm3, %v316_v1, %v319_v63  ;;  %1091 = vmatprep.subr.bf16.mxu1 %v1308_v5  ;;  %v1113_v61 = vpack.c.bf16 %v616_v60, %v615_v59  ;;  %v618_v37 = vld [vmem:[#allocation7 + $0x68] sm:$0xff]  ;;  %v619_v0 = vld [vmem:[#allocation7 + $0x70] sm:$0xff]  ;;  %v620_v1 = vld [vmem:[#allocation7 + $0x78] sm:$0xff] }
 0x11b   :  { %v216_v4 = vsel %vm206_vm4, nan, %v215_v2  ;;  %v321_v6 = vsel %vm206_vm4, nan, %v320_v3  ;;  %v1116_v63 = vpack.c.bf16 %v618_v37, %v617_v62  ;;  %v1119_v2 = vpack.c.bf16 %v620_v1, %v619_v0 }
 0x11c   :  { %v323_v7 = vsel %vm113_vm12, %v216_v4, %v321_v6  ;;  %v829_v4 = vld [vmem:[%s1565_s7] ss:$0 sm:$0xff] }
 0x11d   :  { %937 = vmatmul.mubr.f32.vlgmr.msra.gmra.mrb[0].mxu0 %v323_v7  ;;  %1093 = vmatpush3.bf16.msra.mxu1 %v1092_v28  ;;  %v1134_v28 = vpack.c.bf16 %v714_v27, %v713_v26 }
 0x11e   :  { %1011 = vmatprep.mubr.msk.f32.mxu0 %vm1309_vm0, %v1310_v20  ;;  %1094 = vmatprep.subr.bf16.mxu1 %v1308_v5 }
 0x11f   :  { %1099 = vmatpush3.bf16.msra.mxu0 %v1098_v47 }
 0x120   :  { %1100 = vmatprep.subr.bf16.mxu0 %v1308_v5 }
 0x121   :  { %1096 = vmatpush3.bf16.msra.mxu1 %v1095_v31  ;;  %v1137_v31 = vpack.c.bf16 %v716_v30, %v715_v29 }
 0x122   :  { %1121 = vmatprep.subr.bf16.mxu1 %v1308_v5 }
 0x123   :  { %1102 = vmatpush3.bf16.msra.mxu0 %v1101_v50 }
 0x124   :  { %v516_v33 = vpop.f32.mrb[0].mxu1  ;;  %1103 = vmatprep.subr.bf16.mxu0 %v1308_v5 }
 0x125   :  { %v943_v34 = vpop.f32.mrb[1].mxu1 }
 0x126   :  { %v718_v34 = vld [vmem:[#allocation8 + $0x68] sm:$0xff] }
 0x127   :  { %1105 = vmatpush3.bf16.msra.mxu0 %v1104_v53 }
 0x128   :  { %1106 = vmatprep.subr.bf16.mxu0 %v1308_v5 }
 0x1f0   :  { %v413_v36 = vpop.f32.mrb[0].mxu0 }
 0x1f1   :  { %v414_v38 = vadd.f32 %v825_v35, %v413_v36  ;;  %v938_v39 = vpop.f32.mrb[1].mxu0  ;;  %v719_v36 = vld [vmem:[#allocation8 + $0x70] sm:$0xff] }
 0x1f3   :  { %v826_v40 = vmul.f32 -1.442695, %v414_v38 }
 0x1f5   :  { %1171 = vpow2.f32 %v826_v40  ;;  %v831_v40 = vld [vmem:[%s1567_s9] ss:$0 sm:$0xff]  ;;  %s1271_s9 = scalar_lea.vmem %s806_s26, 128 }
 0x1f6   :  { %p1272_p4 = scmp.ne.s32.totalorder %s806_s26, %s1271_s9  ;;  %p1277_p6 = scmp.lt.s32.totalorder %s1271_s9, %s1271_s9 }
 0x1f8   :  { %p1278_p7 = por %p1277_p6, %p1276_p5 }
 0x1fa   :  { %p1279_p8 = pnand %p1278_p7, %p1272_p4 }
 0x1ff   :  { %v1172_v41 = vpop.eup %1171 }
 0x200   :  { %v420_v42 = vadd.f32 1.0, %v1172_v41 }
 0x202   :  { %1173 = vrcp.f32 %v420_v42 }
 0x20c   :  { %v1174_v43 = vpop.eup %1173 }
 0x20d   :  { %v423_v44 = vmul.f32 %v1174_v43, %v414_v38  ;;  %v720_v38 = vld [vmem:[#allocation8 + $0x78] sm:$0xff] }
 0x20e   :  { %v1143_v39 = vpack.c.bf16 %v720_v38, %v719_v36 }
 0x20f   :  { %977 = vmatmul.mubr.f32.vlgmr.msra.gmra.mrb[2].mxu1 %v423_v44 }
 0x210   :  { %1046 = vmatprep.mubr.msk.f32.mxu1 %vm1309_vm0, %v1310_v20  ;;  %v612_v20 = vld [vmem:[#allocation7 + $0x38] sm:$0xff]  ;;  %1123 = vmatpush3.bf16.msra.mxu1 %v1122_v15 }
 0x211   :  { %v1107_v55 = vpack.c.bf16 %v612_v20, %v611_v54  ;;  %1124 = vmatprep.subr.bf16.mxu1 %v1308_v5 }
 0x213   :  { %1108 = vmatpush3.bf16.msra.mxu0 %v1107_v55 }
 0x214   :  { %1109 = vmatprep.subr.bf16.mxu0 %v1308_v5  ;;  %1126 = vmatpush3.bf16.msra.mxu1 %v1125_v18 }
 0x215   :  { %1127 = vmatprep.subr.bf16.mxu1 %v1308_v5 }
 0x217   :  { %1111 = vmatpush3.bf16.msra.mxu0 %v1110_v58 }
 0x218   :  { %1112 = vmatprep.subr.bf16.mxu0 %v1308_v5  ;;  %1129 = vmatpush3.bf16.msra.mxu1 %v1128_v22 }
 0x219   :  { %1130 = vmatprep.subr.bf16.mxu1 %v1308_v5 }
 0x21b   :  { %1114 = vmatpush3.bf16.msra.mxu0 %v1113_v61 }
 0x21c   :  { %1115 = vmatprep.subr.bf16.mxu0 %v1308_v5  ;;  %1132 = vmatpush3.bf16.msra.mxu1 %v1131_v25 }
 0x21d   :  { %1133 = vmatprep.subr.bf16.mxu1 %v1308_v5 }
 0x21f   :  { %1117 = vmatpush3.bf16.msra.mxu0 %v1116_v63 }
 0x220   :  { %1118 = vmatprep.subr.bf16.mxu0 %v1308_v5  ;;  %1135 = vmatpush3.bf16.msra.mxu1 %v1134_v28 }
 0x221   :  { %1136 = vmatprep.subr.bf16.mxu1 %v1308_v5 }
 0x223   :  { %1120 = vmatpush3.bf16.msra.mxu0 %v1119_v2 }
 0x224   :  { %1138 = vmatpush3.bf16.msra.mxu1 %v1137_v31 }
 0x225   :  { %1139 = vmatprep.subr.bf16.mxu1 %v1308_v5 }
 0x2e2   :  { %v586_v3 = vpop.f32.mrb[2].mxu1 }
 0x2e3   :  { %v587_v6 = vadd.f32 %v586_v3, %v516_v33  ;;  %v978_v7 = vpop.f32.mrb[3].mxu1  ;;  %v717_v33 = vld [vmem:[#allocation8 + $0x60] sm:$0xff] }
 0x2e4   :  { %v1140_v35 = vpack.c.bf16 %v718_v34, %v717_v33 }
 0x2e5   :  { %v597_v8 = vadd.f32 %v829_v4, %v587_v6 }
 0x2e6   :  { %1141 = vmatpush3.bf16.msra.mxu1 %v1140_v35 }
 0x2e7   :  { %v830_v9 = vmul.f32 -1.442695, %v597_v8  ;;  %1142 = vmatprep.subr.bf16.mxu1 %v1308_v5  ;;  %v833_v5 = vld [vmem:[%s1569_s11] ss:$0 sm:$0xff] }
 0x2e9   :  { %1175 = vpow2.f32 %v830_v9 }
 0x2ea   :  { %1144 = vmatpush3.bf16.msra.mxu1 %v1143_v39 }
 0x2f3   :  { %v1176_v10 = vpop.eup %1175 }
 0x2f4   :  { %v601_v11 = vadd.f32 1.0, %v1176_v10 }
 0x2f6   :  { %1177 = vrcp.f32 %v601_v11 }
 0x300   :  { %v1178_v12 = vpop.eup %1177 }
 0x301   :  { %v604_v13 = vmul.f32 %v1178_v12, %v597_v8 }
 0x303   :  { %1012 = vmatmul.mubr.f32.vlgmr.msra.gmra.mrb[2].mxu0 %v604_v13 }
 0x3d6   :  { %v694_v41 = vpop.f32.mrb[2].mxu0 }
 0x3d7   :  { %v695_v42 = vadd.f32 %v831_v40, %v694_v41  ;;  %v1013_v43 = vpop.f32.mrb[3].mxu0 }
 0x3d9   :  { %v832_v44 = vmul.f32 -1.442695, %v695_v42 }
 0x3db   :  { %1179 = vpow2.f32 %v832_v44 }
 0x3e5   :  { %v1180_v45 = vpop.eup %1179 }
 0x3e6   :  { %v701_v46 = vadd.f32 1.0, %v1180_v45 }
 0x3e8   :  { %1181 = vrcp.f32 %v701_v46 }
 0x3f2   :  { %v1182_v47 = vpop.eup %1181 }
 0x3f3   :  { %v704_v48 = vmul.f32 %v1182_v47, %v695_v42 }
 0x3f5   :  { %1047 = vmatmul.mubr.f32.vlgmr.msra.gmra.mrb[4].mxu1 %v704_v48 }
 0x4c8   :  { %v794_v49 = vpop.f32.mrb[4].mxu1 }
 0x4c9   :  { %v795_v50 = vadd.f32 %v833_v5, %v794_v49  ;;  %v1048_v51 = vpop.f32.mrb[5].mxu1 }
 0x4cb   :  { %798 = vst [vmem:[#allocation10] sm:$0xff] %v795_v50 }
 0x4cc   :  { %1282 = shalt.err (!%p1279_p8)
}
 0x4cd   :  { %s1283_s5 = scalar_lea.hbm %s1570_s12, 128 }
 0x4ce   :  { %p1284_p9 = scmp.ne.s32.totalorder %s1570_s12, %s1283_s5  ;;  %p1287_p10 = scmp.lt.u32.totalorder %s1283_s5, %s1570_s12 }
 0x4d0   :  { %p1289_p11 = pnand %p1287_p10, %p1284_p9 }
 0x4d2   :  { %1292 = shalt.err (!%p1289_p11)
}
 0x4d3   :  { %808 = dma.vmem_to_hbm [thread:$0]  %s806_s26, 128, %s1570_s12, [#allocation4]  }
 0x4d4   :  { %1299 = dma.done.wait [#allocation4], 128  }
 0x4d5   :  { %1300 = vsyncadd [#allocation4], 4294967168 }
 0x4d6   :  { %812 = vsyncpa [#allocation3], 1 }
 0x4d7   :  { %813 = vsyncpa [#allocation6], 1 }
 0x4d8   :  { %814 = vsyncpa [#allocation9], 1 }
 0x4d9   :  { %815 = vsyncpa [#allocation4], 1 }

// kernel: tpu_custom_call.1
= control target key start
LH: loop header
LB: loop body
LE: loop exit
PB: predicated region body
PF: predicated region fallthrough
CT: control target
= control target key end

     0   :  { %15 = vsyncpa [#allocation3], 0  ;;  %s1239_s0 = inlined_call_operand.hbm [shape: f32[8,128], index: 0, kind: input, shape index: {}]   ;;  %s1240_s1 = inlined_call_operand.hbm [shape: f32[8,128], index: 1, kind: input, shape index: {}]   ;;  %s1241_s2 = inlined_call_operand.hbm [shape: f32[128,128], index: 2, kind: input, shape index: {}]   ;;  %s1242_s3 = inlined_call_operand.vmem [shape: f32[1,128], index: 3, kind: input, shape index: {}]   ;;  %s1243_s4 = inlined_call_operand.hbm [shape: f32[256,128], index: 4, kind: input, shape index: {}]   ;;  %s1244_s5 = inlined_call_operand.vmem [shape: f32[1,128], index: 5, kind: input, shape index: {}]   ;;  %s1245_s6 = inlined_call_operand.hbm [shape: f32[128,128], index: 6, kind: input, shape index: {}]   ;;  %s1246_s7 = inlined_call_operand.vmem [shape: f32[1,128], index: 7, kind: input, shape index: {}]   ;;  %s1247_s8 = inlined_call_operand.hbm [shape: f32[128,128], index: 8, kind: input, shape index: {}]   ;;  %s1248_s9 = inlined_call_operand.vmem [shape: f32[1,128], index: 9, kind: input, shape index: {}]   ;;  %s1249_s10 = inlined_call_operand.hbm [shape: f32[8,128], index: 10, kind: output, shape index: {}]  }
   0x1   :  { %16 = vsyncpa [#allocation6], 0 }
   0x2   :  { %17 = vsyncpa [#allocation9], 0 }
   0x3   :  { %18 = vsyncpa [#allocation12], 0 }
   0x4   :  { %19 = vsyncpa [#allocation4], 0  ;;  %s1034_s13 = smov [#allocation5]   ;;  %s870_s17 = scalar_lea.hbm %s1240_s1, 128 }
   0x5   :  { %s36_s14 = sshll.u32 %s1034_s13, 4  ;;  %p871_p0 = scmp.ne.s32.totalorder %s1240_s1, %s870_s17  ;;  %s37_s14 = int_to_ptr.vmem [resolvable:$true] %s36_s14 }
   0x6   :  { %p874_p1 = scmp.lt.u32.totalorder %s870_s17, %s1240_s1 }
   0x8   :  { %p876_p2 = pnand %p874_p1, %p871_p0 }
   0xa   :  { %879 = shalt.err (!%p876_p2)
}
   0xb   :  { %s880_s22 = scalar_lea.vmem %s37_s14, 128  ;;  %p885_p4 = scmp.lt.s32.totalorder %s37_s14, %s37_s14 }
   0xc   :  { %p881_p3 = scmp.ne.s32.totalorder %s37_s14, %s880_s22  ;;  %p886_p5 = scmp.lt.s32.totalorder %s880_s22, %s880_s22 }
   0xe   :  { %p887_p6 = por %p886_p5, %p885_p4 }
  0x10   :  { %p888_p7 = pnand %p887_p6, %p881_p3 }
  0x12   :  { %891 = shalt.err (!%p888_p7)
}
  0x13   :  { %39 = dma.hbm_to_vmem [thread:$0]  %s1240_s1, 128, %s37_s14, [#allocation6]  }
  0x14   :  { %s1035_s25 = smov [#allocation8]   ;;  %s1036_s27 = smov [#allocation2]  }
  0x15   :  { %s59_s26 = sshll.u32 %s1035_s25, 4  ;;  %s26_s28 = sshll.u32 %s1036_s27, 4  ;;  %s60_s26 = int_to_ptr.vmem [resolvable:$true] %s59_s26  ;;  %s27_s28 = int_to_ptr.vmem [resolvable:$true] %s26_s28 }
  0x16   :  { %s892_s11 = scalar_lea.hbm %s1243_s4, 4096 }
  0x17   :  { %p893_p8 = scmp.ne.s32.totalorder %s1243_s4, %s892_s11  ;;  %p896_p9 = scmp.lt.u32.totalorder %s892_s11, %s1243_s4 }
  0x19   :  { %p898_p10 = pnand %p896_p9, %p893_p8 }
  0x1b   :  { %901 = shalt.err (!%p898_p10)
}
  0x1c   :  { %s902_s1 = scalar_lea.vmem %s60_s26, 4096  ;;  %p907_p12 = scmp.lt.s32.totalorder %s60_s26, %s60_s26 }
  0x1d   :  { %p903_p11 = scmp.ne.s32.totalorder %s60_s26, %s902_s1  ;;  %p908_p13 = scmp.lt.s32.totalorder %s902_s1, %s902_s1 }
  0x1f   :  { %p909_p0 = por %p908_p13, %p907_p12 }
  0x21   :  { %p910_p1 = pnand %p909_p0, %p903_p11 }
  0x23   :  { %913 = shalt.err (!%p910_p1)
}
  0x24   :  { %s1037_s14 = smov 128   ;;  %s1038_s17 = smov 8  }
  0x25   :  { %65 = dma.hbm_to_vmem [thread:$0]  %s1243_s4, 4096, %s60_s26, [#allocation9], %s1037_s14, %s1037_s14, %s1038_s17  }
  0x26   :  { %s914_s22 = scalar_lea.hbm %s1239_s0, 128 }
  0x27   :  { %p915_p2 = scmp.ne.s32.totalorder %s1239_s0, %s914_s22  ;;  %p918_p3 = scmp.lt.u32.totalorder %s914_s22, %s1239_s0 }
  0x29   :  { %p920_p4 = pnand %p918_p3, %p915_p2 }
  0x2b   :  { %923 = shalt.err (!%p920_p4)
}
  0x2c   :  { %s924_s29 = scalar_lea.vmem %s27_s28, 128  ;;  %p929_p6 = scmp.lt.s32.totalorder %s27_s28, %s27_s28 }
  0x2d   :  { %p925_p5 = scmp.ne.s32.totalorder %s27_s28, %s924_s29  ;;  %p930_p7 = scmp.lt.s32.totalorder %s924_s29, %s924_s29 }
  0x2f   :  { %p931_p8 = por %p930_p7, %p929_p6 }
  0x31   :  { %p932_p9 = pnand %p931_p8, %p925_p5 }
  0x33   :  { %935 = shalt.err (!%p932_p9)
}
  0x34   :  { %29 = dma.hbm_to_vmem [thread:$0]  %s1239_s0, 128, %s27_s28, [#allocation3]  }
  0x35   :  { %s1039_s30 = smov [#allocation7]   ;;  %s1040_s12 = smov [#allocation10]  }
  0x36   :  { %s45_s11 = sshll.u32 %s1039_s30, 4  ;;  %s73_s13 = sshll.u32 %s1040_s12, 4  ;;  %s46_s11 = int_to_ptr.vmem [resolvable:$true] %s45_s11  ;;  %s74_s13 = int_to_ptr.vmem [resolvable:$true] %s73_s13 }
  0x37   :  { %s936_s1 = scalar_lea.hbm %s1241_s2, 2048 }
  0x38   :  { %p937_p10 = scmp.ne.s32.totalorder %s1241_s2, %s936_s1  ;;  %p940_p11 = scmp.lt.u32.totalorder %s936_s1, %s1241_s2 }
  0x3a   :  { %p942_p12 = pnand %p940_p11, %p937_p10 }
  0x3c   :  { %945 = shalt.err (!%p942_p12)
}
  0x3d   :  { %s946_s0 = scalar_lea.vmem %s46_s11, 2048  ;;  %p951_p0 = scmp.lt.s32.totalorder %s46_s11, %s46_s11 }
  0x3e   :  { %p947_p13 = scmp.ne.s32.totalorder %s46_s11, %s946_s0  ;;  %p952_p1 = scmp.lt.s32.totalorder %s946_s0, %s946_s0 }
  0x40   :  { %p953_p2 = por %p952_p1, %p951_p0 }
  0x42   :  { %p954_p3 = pnand %p953_p2, %p947_p13 }
  0x44   :  { %957 = shalt.err (!%p954_p3)
}
  0x45   :  { %51 = dma.hbm_to_vmem [thread:$0]  %s1241_s2, 2048, %s46_s11, [#allocation6], %s1037_s14, %s1037_s14, %s1038_s17  }
  0x46   :  { %s958_s25 = scalar_lea.hbm %s1245_s6, 2048 }
  0x47   :  { %p959_p4 = scmp.ne.s32.totalorder %s1245_s6, %s958_s25  ;;  %p962_p5 = scmp.lt.u32.totalorder %s958_s25, %s1245_s6 }
  0x49   :  { %p964_p6 = pnand %p962_p5, %p959_p4 }
  0x4b   :  { %967 = shalt.err (!%p964_p6)
}
  0x4c   :  { %s968_s30 = scalar_lea.vmem %s74_s13, 2048  ;;  %p973_p8 = scmp.lt.s32.totalorder %s74_s13, %s74_s13 }
  0x4d   :  { %p969_p7 = scmp.ne.s32.totalorder %s74_s13, %s968_s30  ;;  %p974_p9 = scmp.lt.s32.totalorder %s968_s30, %s968_s30 }
  0x4f   :  { %p975_p10 = por %p974_p9, %p973_p8 }
  0x51   :  { %p976_p11 = pnand %p975_p10, %p969_p7 }
  0x53   :  { %979 = shalt.err (!%p976_p11)
}
  0x54   :  { %79 = dma.hbm_to_vmem [thread:$0]  %s1245_s6, 2048, %s74_s13, [#allocation9], %s1037_s14, %s1037_s14, %s1038_s17  }
  0x55   :  { %s1041_s12 = smov [#allocation11]   ;;  %s980_s18 = scalar_lea.hbm %s1247_s8, 2048 }
  0x56   :  { %s87_s15 = sshll.u32 %s1041_s12, 4  ;;  %p981_p12 = scmp.ne.s32.totalorder %s1247_s8, %s980_s18  ;;  %s88_s15 = int_to_ptr.vmem [resolvable:$true] %s87_s15 }
  0x57   :  { %p984_p13 = scmp.lt.u32.totalorder %s980_s18, %s1247_s8 }
  0x59   :  { %p986_p0 = pnand %p984_p13, %p981_p12 }
  0x5b   :  { %989 = shalt.err (!%p986_p0)
}
  0x5c   :  { %s990_s28 = scalar_lea.vmem %s88_s15, 2048  ;;  %p995_p2 = scmp.lt.s32.totalorder %s88_s15, %s88_s15 }
  0x5d   :  { %p991_p1 = scmp.ne.s32.totalorder %s88_s15, %s990_s28  ;;  %p996_p3 = scmp.lt.s32.totalorder %s990_s28, %s990_s28 }
  0x5f   :  { %p997_p4 = por %p996_p3, %p995_p2 }
  0x61   :  { %p998_p5 = pnand %p997_p4, %p991_p1 }
  0x63   :  { %1001 = shalt.err (!%p998_p5)
}
  0x64   :  { %93 = dma.hbm_to_vmem [thread:$0]  %s1247_s8, 2048, %s88_s15, [#allocation12], %s1037_s14, %s1037_s14, %s1038_s17  }
  0x65   :  { %1024 = dma.done.wait [#allocation3], 128  }
  0x66   :  { %1025 = vsyncadd [#allocation3], 4294967168 }
  0x67   :  { %1026 = dma.done.wait [#allocation6], 2176  }
  0x68   :  { %1027 = vsyncadd [#allocation6], 4294965120 }
  0x69   :  { %1028 = dma.done.wait [#allocation9], 6144  }
  0x6a   :  { %1029 = vsyncadd [#allocation9], 4294961152 }
  0x6b   :  { %1030 = dma.done.wait [#allocation12], 2048  }
  0x6c   :  { %1031 = vsyncadd [#allocation12], 4294965248  ;;  %v1042_v0 = vmov 0.0|0.0   ;;  %vm1043_vm0 = vmmov 0   ;;  %v1044_v1 = vmov 0.0   ;;  %v115_v2 = vld [vmem:[#allocation7] sm:$0xff] }
  0x6d   :  { %742 = vmatprep.subr.bf16.mxu0 %v1042_v0  ;;  %669 = vmatprep.mubr.msk.f32.mxu0 %vm1043_vm0, %v1044_v1  ;;  %v116_v3 = vld [vmem:[#allocation7 + $0x8] sm:$0xff]  ;;  %v117_v4 = vld [vmem:[#allocation7 + $0x10] sm:$0xff]  ;;  %v118_v6 = vld [vmem:[#allocation7 + $0x18] sm:$0xff]  ;;  %s1045_s25 = smov [#allocation13]  }
  0x6e   :  { %v743_v5 = vpack.c.bf16 %v116_v3, %v115_v2  ;;  %v746_v7 = vpack.c.bf16 %v118_v6, %v117_v4  ;;  %v119_v8 = vld [vmem:[#allocation7 + $0x20] sm:$0xff]  ;;  %v120_v9 = vld [vmem:[#allocation7 + $0x28] sm:$0xff]  ;;  %v121_v11 = vld [vmem:[#allocation7 + $0x30] sm:$0xff]  ;;  %s532_s27 = sshll.u32 %s1045_s25, 4  ;;  %s533_s27 = int_to_ptr.vmem [resolvable:$true] %s532_s27 }
  0x6f   :  { %v749_v10 = vpack.c.bf16 %v120_v9, %v119_v8  ;;  %v122_v12 = vld [vmem:[#allocation7 + $0x38] sm:$0xff]  ;;  %v123_v14 = vld [vmem:[#allocation7 + $0x40] sm:$0xff]  ;;  %v124_v15 = vld [vmem:[#allocation7 + $0x48] sm:$0xff]  ;;  %p1007_p7 = scmp.lt.s32.totalorder %s533_s27, %s533_s27 }
  0x70   :  { %744 = vmatpush3.bf16.msra.mxu0 %v743_v5  ;;  %v752_v13 = vpack.c.bf16 %v122_v12, %v121_v11  ;;  %v755_v16 = vpack.c.bf16 %v124_v15, %v123_v14  ;;  %v125_v17 = vld [vmem:[#allocation7 + $0x50] sm:$0xff]  ;;  %v126_v18 = vld [vmem:[#allocation7 + $0x58] sm:$0xff]  ;;  %v127_v20 = vld [vmem:[#allocation7 + $0x60] sm:$0xff] }
  0x71   :  { %745 = vmatprep.subr.bf16.mxu0 %v1042_v0  ;;  %v758_v19 = vpack.c.bf16 %v126_v18, %v125_v17  ;;  %v128_v21 = vld [vmem:[#allocation7 + $0x68] sm:$0xff]  ;;  %v129_v23 = vld [vmem:[#allocation7 + $0x70] sm:$0xff]  ;;  %v130_v24 = vld [vmem:[#allocation7 + $0x78] sm:$0xff] }
  0x72   :  { %v761_v22 = vpack.c.bf16 %v128_v21, %v127_v20  ;;  %v764_v25 = vpack.c.bf16 %v130_v24, %v129_v23  ;;  %v114_v26 = vld [vmem:[#allocation2] sm:$0xff]  ;;  %v232_v27 = vld [vmem:[#allocation8 + $0x80] sm:$0xff]  ;;  %v233_v28 = vld [vmem:[#allocation8 + $0x88] sm:$0xff] }
  0x73   :  { %v766_v29 = vpack.c.bf16 %v233_v28, %v232_v27  ;;  %v216_v30 = vld [vmem:[#allocation8] sm:$0xff]  ;;  %v217_v31 = vld [vmem:[#allocation8 + $0x8] sm:$0xff]  ;;  %v234_v33 = vld [vmem:[#allocation8 + $0x90] sm:$0xff] }
  0x74   :  { %747 = vmatpush3.bf16.msra.mxu0 %v746_v7  ;;  %v768_v32 = vpack.c.bf16 %v217_v31, %v216_v30  ;;  %v235_v34 = vld [vmem:[#allocation8 + $0x98] sm:$0xff]  ;;  %v218_v36 = vld [vmem:[#allocation8 + $0x10] sm:$0xff]  ;;  %v236_v39 = vld [vmem:[#allocation8 + $0xa0] sm:$0xff] }
  0x75   :  { %748 = vmatprep.subr.bf16.mxu0 %v1042_v0  ;;  %767 = vmatprep.subr.bf16.mxu1 %v766_v29  ;;  %v770_v35 = vpack.c.bf16 %v235_v34, %v234_v33  ;;  %v219_v37 = vld [vmem:[#allocation8 + $0x18] sm:$0xff]  ;;  %v237_v40 = vld [vmem:[#allocation8 + $0xa8] sm:$0xff]  ;;  %v220_v42 = vld [vmem:[#allocation8 + $0x20] sm:$0xff] }
  0x76   :  { %769 = vmatpush3.bf16.msra.mxu1 %v768_v32  ;;  %v772_v38 = vpack.c.bf16 %v219_v37, %v218_v36  ;;  %v774_v41 = vpack.c.bf16 %v237_v40, %v236_v39  ;;  %v221_v43 = vld [vmem:[#allocation8 + $0x28] sm:$0xff]  ;;  %v238_v45 = vld [vmem:[#allocation8 + $0xb0] sm:$0xff]  ;;  %v239_v46 = vld [vmem:[#allocation8 + $0xb8] sm:$0xff] }
  0x77   :  { %771 = vmatprep.subr.bf16.mxu1 %v770_v35  ;;  %v776_v44 = vpack.c.bf16 %v221_v43, %v220_v42  ;;  %v778_v47 = vpack.c.bf16 %v239_v46, %v238_v45  ;;  %v222_v48 = vld [vmem:[#allocation8 + $0x30] sm:$0xff]  ;;  %v223_v49 = vld [vmem:[#allocation8 + $0x38] sm:$0xff]  ;;  %v240_v51 = vld [vmem:[#allocation8 + $0xc0] sm:$0xff] }
  0x78   :  { %750 = vmatpush3.bf16.msra.mxu0 %v749_v10  ;;  %v780_v50 = vpack.c.bf16 %v223_v49, %v222_v48  ;;  %v241_v52 = vld [vmem:[#allocation8 + $0xc8] sm:$0xff]  ;;  %v224_v54 = vld [vmem:[#allocation8 + $0x40] sm:$0xff]  ;;  %v242_v57 = vld [vmem:[#allocation8 + $0xd0] sm:$0xff] }
  0x79   :  { %751 = vmatprep.subr.bf16.mxu0 %v1042_v0  ;;  %v782_v53 = vpack.c.bf16 %v241_v52, %v240_v51  ;;  %v225_v55 = vld [vmem:[#allocation8 + $0x48] sm:$0xff]  ;;  %v243_v58 = vld [vmem:[#allocation8 + $0xd8] sm:$0xff]  ;;  %v226_v60 = vld [vmem:[#allocation8 + $0x50] sm:$0xff] }
  0x7a   :  { %773 = vmatpush3.bf16.msra.mxu1 %v772_v38  ;;  %v784_v56 = vpack.c.bf16 %v225_v55, %v224_v54  ;;  %v786_v59 = vpack.c.bf16 %v243_v58, %v242_v57  ;;  %v227_v61 = vld [vmem:[#allocation8 + $0x58] sm:$0xff]  ;;  %v244_v62 = vld [vmem:[#allocation8 + $0xe0] sm:$0xff]  ;;  %v245_v2 = vld [vmem:[#allocation8 + $0xe8] sm:$0xff] }
  0x7b   :  { %775 = vmatprep.subr.bf16.mxu1 %v774_v41  ;;  %v788_v63 = vpack.c.bf16 %v227_v61, %v226_v60  ;;  %v228_v3 = vld [vmem:[#allocation8 + $0x60] sm:$0xff]  ;;  %v229_v4 = vld [vmem:[#allocation8 + $0x68] sm:$0xff]  ;;  %v790_v5 = vpack.c.bf16 %v245_v2, %v244_v62  ;;  %v246_v6 = vld [vmem:[#allocation8 + $0xf0] sm:$0xff] }
  0x7c   :  { %753 = vmatpush3.bf16.msra.mxu0 %v752_v13  ;;  %v247_v7 = vld [vmem:[#allocation8 + $0xf8] sm:$0xff]  ;;  %v792_v8 = vpack.c.bf16 %v229_v4, %v228_v3  ;;  %v230_v10 = vld [vmem:[#allocation8 + $0x70] sm:$0xff]  ;;  %v332_v23 = vld [vmem:[#allocation10] sm:$0xff] }
  0x7d   :  { %754 = vmatprep.subr.bf16.mxu0 %v1042_v0  ;;  %v794_v9 = vpack.c.bf16 %v247_v7, %v246_v6  ;;  %v231_v11 = vld [vmem:[#allocation8 + $0x78] sm:$0xff]  ;;  %v544_v13 = vld [vmem:[%s1242_s3] ss:$0 sm:$0xff]  ;;  %v333_v24 = vld [vmem:[#allocation10 + $0x8] sm:$0xff] }
  0x7e   :  { %777 = vmatpush3.bf16.msra.mxu1 %v776_v44  ;;  %v796_v12 = vpack.c.bf16 %v231_v11, %v230_v10  ;;  %v335_v27 = vld [vmem:[#allocation10 + $0x18] sm:$0xff]  ;;  %v336_v29 = vld [vmem:[#allocation10 + $0x20] sm:$0xff]  ;;  %v337_v30 = vld [vmem:[#allocation10 + $0x28] sm:$0xff] }
  0x7f   :  { %779 = vmatprep.subr.bf16.mxu1 %v778_v47  ;;  %v805_v31 = vpack.c.bf16 %v337_v30, %v336_v29  ;;  %v338_v32 = vld [vmem:[#allocation10 + $0x30] sm:$0xff]  ;;  %v340_v34 = vld [vmem:[#allocation10 + $0x40] sm:$0xff]  ;;  %v341_v35 = vld [vmem:[#allocation10 + $0x48] sm:$0xff] }
  0x80   :  { %756 = vmatpush3.bf16.msra.mxu0 %v755_v16  ;;  %v811_v36 = vpack.c.bf16 %v341_v35, %v340_v34  ;;  %v342_v37 = vld [vmem:[#allocation10 + $0x50] sm:$0xff]  ;;  %v343_v38 = vld [vmem:[#allocation10 + $0x58] sm:$0xff]  ;;  %v344_v40 = vld [vmem:[#allocation10 + $0x60] sm:$0xff] }
  0x81   :  { %757 = vmatprep.subr.bf16.mxu0 %v1042_v0  ;;  %v814_v39 = vpack.c.bf16 %v343_v38, %v342_v37  ;;  %v345_v41 = vld [vmem:[#allocation10 + $0x68] sm:$0xff]  ;;  %v346_v43 = vld [vmem:[#allocation10 + $0x70] sm:$0xff]  ;;  %v347_v44 = vld [vmem:[#allocation10 + $0x78] sm:$0xff] }
  0x82   :  { %781 = vmatpush3.bf16.msra.mxu1 %v780_v50  ;;  %v817_v42 = vpack.c.bf16 %v345_v41, %v344_v40  ;;  %v820_v45 = vpack.c.bf16 %v347_v44, %v346_v43  ;;  %v546_v47 = vld [vmem:[%s1244_s5] ss:$0 sm:$0xff]  ;;  %v433_v57 = vld [vmem:[#allocation11 + $0x8] sm:$0xff]  ;;  %v435_v60 = vld [vmem:[#allocation11 + $0x18] sm:$0xff] }
  0x83   :  { %783 = vmatprep.subr.bf16.mxu1 %v782_v53  ;;  %v436_v62 = vld [vmem:[#allocation11 + $0x20] sm:$0xff]  ;;  %v438_v3 = vld [vmem:[#allocation11 + $0x30] sm:$0xff]  ;;  %v439_v4 = vld [vmem:[#allocation11 + $0x38] sm:$0xff] }
  0x84   :  { %759 = vmatpush3.bf16.msra.mxu0 %v758_v19  ;;  %v440_v6 = vld [vmem:[#allocation11 + $0x40] sm:$0xff]  ;;  %v441_v7 = vld [vmem:[#allocation11 + $0x48] sm:$0xff]  ;;  %v443_v10 = vld [vmem:[#allocation11 + $0x58] sm:$0xff] }
  0x85   :  { %760 = vmatprep.subr.bf16.mxu0 %v1042_v0 }
  0x86   :  { %785 = vmatpush3.bf16.msra.mxu1 %v784_v56  ;;  %v432_v56 = vld [vmem:[#allocation11] sm:$0xff] }
  0x87   :  { %787 = vmatprep.subr.bf16.mxu1 %v786_v59  ;;  %v823_v58 = vpack.c.bf16 %v433_v57, %v432_v56  ;;  %v434_v59 = vld [vmem:[#allocation11 + $0x10] sm:$0xff] }
  0x88   :  { %762 = vmatpush3.bf16.msra.mxu0 %v761_v22  ;;  %v215_v22 = vld [vmem:[#allocation5] sm:$0xff]  ;;  %v826_v61 = vpack.c.bf16 %v435_v60, %v434_v59 }
  0x89   :  { %763 = vmatprep.subr.bf16.mxu0 %v1042_v0 }
  0x8a   :  { %789 = vmatpush3.bf16.msra.mxu1 %v788_v63  ;;  %v437_v63 = vld [vmem:[#allocation11 + $0x28] sm:$0xff] }
  0x8b   :  { %791 = vmatprep.subr.bf16.mxu1 %v790_v5  ;;  %v829_v2 = vpack.c.bf16 %v437_v63, %v436_v62  ;;  %v832_v5 = vpack.c.bf16 %v439_v4, %v438_v3 }
  0x8c   :  { %765 = vmatpush3.bf16.msra.mxu0 %v764_v25  ;;  %v799_v25 = vpack.c.bf16 %v333_v24, %v332_v23 }
  0x8d   :  { %798 = vmatprep.subr.bf16.mxu0 %v1042_v0 }
  0x8e   :  { %793 = vmatpush3.bf16.msra.mxu1 %v792_v8  ;;  %v835_v8 = vpack.c.bf16 %v441_v7, %v440_v6 }
  0x8f   :  { %670 = vmatmul.mubr.f32.vlgmr.msra.gmra.mrb[0].mxu0 %v114_v26  ;;  %795 = vmatprep.subr.bf16.mxu1 %v794_v9  ;;  %v334_v26 = vld [vmem:[#allocation10 + $0x10] sm:$0xff] }
  0x90   :  { %704 = vmatprep.mubr.msk.f32.mxu0 %vm1043_vm0, %v1044_v1  ;;  %800 = vmatpush3.bf16.msra.mxu0 %v799_v25  ;;  %v802_v28 = vpack.c.bf16 %v335_v27, %v334_v26  ;;  %v442_v9 = vld [vmem:[#allocation11 + $0x50] sm:$0xff] }
  0x91   :  { %801 = vmatprep.subr.bf16.mxu0 %v1042_v0  ;;  %v838_v11 = vpack.c.bf16 %v443_v10, %v442_v9 }
  0x92   :  { %797 = vmatpush3.bf16.msra.mxu1 %v796_v12  ;;  %v444_v12 = vld [vmem:[#allocation11 + $0x60] sm:$0xff] }
  0x93   :  { %822 = vmatprep.subr.bf16.mxu1 %v1042_v0 }
  0x94   :  { %803 = vmatpush3.bf16.msra.mxu0 %v802_v28 }
  0x95   :  { %804 = vmatprep.subr.bf16.mxu0 %v1042_v0 }
  0x98   :  { %806 = vmatpush3.bf16.msra.mxu0 %v805_v31 }
  0x99   :  { %807 = vmatprep.subr.bf16.mxu0 %v1042_v0 }
 0x162   :  { %v204_v14 = vpop.f32.mrb[0].mxu0 }
 0x163   :  { %v205_v15 = vadd.f32 %v544_v13, %v204_v14  ;;  %v671_v16 = vpop.f32.mrb[1].mxu0  ;;  %v445_v13 = vld [vmem:[#allocation11 + $0x68] sm:$0xff] }
 0x164   :  { %v841_v14 = vpack.c.bf16 %v445_v13, %v444_v12  ;;  %v447_v16 = vld [vmem:[#allocation11 + $0x78] sm:$0xff] }
 0x165   :  { %v545_v17 = vmul.f32 -1.442695, %v205_v15 }
 0x167   :  { %858 = vpow2.f32 %v545_v17 }
 0x171   :  { %v859_v18 = vpop.eup %858 }
 0x172   :  { %v211_v19 = vadd.f32 1.0, %v859_v18  ;;  %v548_v18 = vld [vmem:[%s1246_s7] ss:$0 sm:$0xff]  ;;  %s1002_s7 = scalar_lea.vmem %s533_s27, 128 }
 0x173   :  { %p1003_p6 = scmp.ne.s32.totalorder %s533_s27, %s1002_s7  ;;  %p1008_p8 = scmp.lt.s32.totalorder %s1002_s7, %s1002_s7 }
 0x174   :  { %860 = vrcp.f32 %v211_v19 }
 0x175   :  { %p1009_p9 = por %p1008_p8, %p1007_p7 }
 0x177   :  { %p1010_p10 = pnand %p1009_p9, %p1003_p6 }
 0x17e   :  { %v861_v20 = vpop.eup %860 }
 0x17f   :  { %v214_v21 = vmul.f32 %v861_v20, %v205_v15  ;;  %v446_v15 = vld [vmem:[#allocation11 + $0x70] sm:$0xff] }
 0x180   :  { %v844_v17 = vpack.c.bf16 %v447_v16, %v446_v15 }
 0x181   :  { %319 = vmatprep.mubr.f32.mxu1 %v214_v21 }
 0x182   :  { %320 = vmatmul.mubr.f32.vlgmr.msra.gmra.mrb[0].mxu1 %v215_v22 }
 0x183   :  { %739 = vmatprep.mubr.msk.f32.mxu1 %vm1043_vm0, %v1044_v1  ;;  %v339_v1 = vld [vmem:[#allocation10 + $0x38] sm:$0xff]  ;;  %824 = vmatpush3.bf16.msra.mxu1 %v823_v58 }
 0x184   :  { %v808_v33 = vpack.c.bf16 %v339_v1, %v338_v32  ;;  %825 = vmatprep.subr.bf16.mxu1 %v1042_v0 }
 0x186   :  { %809 = vmatpush3.bf16.msra.mxu0 %v808_v33 }
 0x187   :  { %810 = vmatprep.subr.bf16.mxu0 %v1042_v0  ;;  %827 = vmatpush3.bf16.msra.mxu1 %v826_v61 }
 0x188   :  { %828 = vmatprep.subr.bf16.mxu1 %v1042_v0 }
 0x18a   :  { %812 = vmatpush3.bf16.msra.mxu0 %v811_v36 }
 0x18b   :  { %813 = vmatprep.subr.bf16.mxu0 %v1042_v0  ;;  %830 = vmatpush3.bf16.msra.mxu1 %v829_v2 }
 0x18c   :  { %831 = vmatprep.subr.bf16.mxu1 %v1042_v0 }
 0x18e   :  { %815 = vmatpush3.bf16.msra.mxu0 %v814_v39 }
 0x18f   :  { %816 = vmatprep.subr.bf16.mxu0 %v1042_v0  ;;  %833 = vmatpush3.bf16.msra.mxu1 %v832_v5 }
 0x190   :  { %834 = vmatprep.subr.bf16.mxu1 %v1042_v0 }
 0x192   :  { %818 = vmatpush3.bf16.msra.mxu0 %v817_v42 }
 0x193   :  { %819 = vmatprep.subr.bf16.mxu0 %v1042_v0  ;;  %836 = vmatpush3.bf16.msra.mxu1 %v835_v8 }
 0x194   :  { %837 = vmatprep.subr.bf16.mxu1 %v1042_v0 }
 0x196   :  { %821 = vmatpush3.bf16.msra.mxu0 %v820_v45 }
 0x197   :  { %839 = vmatpush3.bf16.msra.mxu1 %v838_v11 }
 0x198   :  { %840 = vmatprep.subr.bf16.mxu1 %v1042_v0 }
 0x19b   :  { %842 = vmatpush3.bf16.msra.mxu1 %v841_v14 }
 0x19c   :  { %843 = vmatprep.subr.bf16.mxu1 %v1042_v0  ;;  %v550_v0 = vld [vmem:[%s1248_s9] ss:$0 sm:$0xff] }
 0x19f   :  { %845 = vmatpush3.bf16.msra.mxu1 %v844_v17 }
 0x255   :  { %v600_v46 = vpop.f32.mrb[0].mxu1 }
 0x256   :  { %v601_v48 = vpop.f32.mrb[1].mxu1 }
 0x257   :  { %v602_v49 = vadd.f32 %v601_v48, %v600_v46 }
 0x259   :  { %v322_v50 = vadd.f32 %v602_v49, %v546_v47 }
 0x25b   :  { %v547_v51 = vmul.f32 -1.442695, %v322_v50 }
 0x25d   :  { %862 = vpow2.f32 %v547_v51 }
 0x267   :  { %v863_v52 = vpop.eup %862 }
 0x268   :  { %v328_v53 = vadd.f32 1.0, %v863_v52 }
 0x26a   :  { %864 = vrcp.f32 %v328_v53 }
 0x274   :  { %v865_v54 = vpop.eup %864 }
 0x275   :  { %v331_v55 = vmul.f32 %v865_v54, %v322_v50 }
 0x277   :  { %705 = vmatmul.mubr.f32.vlgmr.msra.gmra.mrb[2].mxu0 %v331_v55 }
 0x34a   :  { %v421_v19 = vpop.f32.mrb[2].mxu0 }
 0x34b   :  { %v422_v20 = vadd.f32 %v548_v18, %v421_v19  ;;  %v706_v21 = vpop.f32.mrb[3].mxu0 }
 0x34d   :  { %v549_v22 = vmul.f32 -1.442695, %v422_v20 }
 0x34f   :  { %866 = vpow2.f32 %v549_v22 }
 0x359   :  { %v867_v23 = vpop.eup %866 }
 0x35a   :  { %v428_v24 = vadd.f32 1.0, %v867_v23 }
 0x35c   :  { %868 = vrcp.f32 %v428_v24 }
 0x366   :  { %v869_v25 = vpop.eup %868 }
 0x367   :  { %v431_v26 = vmul.f32 %v869_v25, %v422_v20 }
 0x369   :  { %740 = vmatmul.mubr.f32.vlgmr.msra.gmra.mrb[2].mxu1 %v431_v26 }
 0x43c   :  { %v521_v27 = vpop.f32.mrb[2].mxu1 }
 0x43d   :  { %v522_v28 = vadd.f32 %v550_v0, %v521_v27  ;;  %v741_v29 = vpop.f32.mrb[3].mxu1 }
 0x43f   :  { %525 = vst [vmem:[#allocation13] sm:$0xff] %v522_v28 }
 0x440   :  { %1013 = shalt.err (!%p1010_p10)
}
 0x441   :  { %s1014_s26 = scalar_lea.hbm %s1249_s10, 128 }
 0x442   :  { %p1015_p11 = scmp.ne.s32.totalorder %s1249_s10, %s1014_s26  ;;  %p1018_p12 = scmp.lt.u32.totalorder %s1014_s26, %s1249_s10 }
 0x444   :  { %p1020_p13 = pnand %p1018_p12, %p1015_p11 }
 0x446   :  { %1023 = shalt.err (!%p1020_p13)
}
 0x447   :  { %535 = dma.vmem_to_hbm [thread:$0]  %s533_s27, 128, %s1249_s10, [#allocation4]  }
 0x448   :  { %1032 = dma.done.wait [#allocation4], 128  }
 0x449   :  { %1033 = vsyncadd [#allocation4], 4294967168 }
 0x44a   :  { %539 = vsyncpa [#allocation3], 1 }
 0x44b   :  { %540 = vsyncpa [#allocation6], 1 }
 0x44c   :  { %541 = vsyncpa [#allocation9], 1 }
 0x44d   :  { %542 = vsyncpa [#allocation12], 1 }
 0x44e   :  { %543 = vsyncpa [#allocation4], 1 }

</bundles_post_ra>
